<compile_context>
chip_gen: v7x
topology: tpu7x:2x2x1
jax: 0.10.0
libtpu: 0.0.40
codegen_flags: <defaults>
</compile_context>

<pallas_src>
import functools

import jax
import jax.numpy as jnp
from jax.experimental import pallas as pl
from jax.experimental.pallas import tpu as pltpu

NEG_SLOPE = 0.01   # nn.LeakyReLU default
BN_EPS = 1e-5      # nn.BatchNorm1d default


def _leaky(t):
    return jnp.where(t >= 0, t, NEG_SLOPE * t)


def tcn_kernel(N, L, K, x_ref,
               w1a, g1a, be1a,
               w1b, g1b, be1b,
               w2a, g2a, be2a,
               w2b, g2b, be2b,
               out_ref):
    NL = N * L
    inv_nl = 1.0 / float(NL)

    # Hoisted once: per-row position inside its sequence (column vector; broadcast
    # across lanes inside jnp.where) and an all-ones row for MXU reductions.
    row_mod = jax.lax.broadcasted_iota(jnp.int32, (NL, 1), 0) % L
    ones_row = jnp.ones((1, NL), jnp.float32)
    mask_cache = {}

    def seq_mask(shift):
        # (row % L) >= shift: zero-padding at each sequence start, and no tap leakage
        # across batch boundaries in the flat (N*L) layout (neutralizes roll wraparound).
        if shift not in mask_cache:
            mask_cache[shift] = row_mod >= shift
        return mask_cache[shift]

    def conv(h, w_ref, dilation):
        # Causal dilated conv1d (stride=1) as K accumulated MXU matmuls, one per tap.
        # Taps/weights are bf16, accumulation is f32.  Conv bias is intentionally not
        # added: a per-channel constant before training-mode BatchNorm cancels exactly
        # in (x - batch_mean) (mathematical identity, not an approximation).
        acc = None
        for k in range(K):
            shift = (K - 1 - k) * dilation          # causal time offset of tap k
            if shift == 0:
                tap = h
            else:
                tap = jnp.where(seq_mask(shift),
                                pltpu.roll(h, shift, axis=0), 0.0)
            y = jnp.dot(tap.astype(jnp.bfloat16), w_ref[k],
                        preferred_element_type=jnp.float32)
            acc = y if acc is None else acc + y
        return acc

    def bn_leaky(h, g_ref, be_ref):
        # Training-mode BatchNorm1d over the flattened (N*L, C) activations (biased
        # variance, two-pass form) followed by LeakyReLU.  Both per-channel reductions
        # run on the MXU (ones-row matmuls) instead of the XLU; normalize is one FMA.
        g = g_ref[...]
        be = be_ref[...]
        mean = jnp.dot(ones_row, h, preferred_element_type=jnp.float32) * inv_nl
        d = h - mean
        var = jnp.dot(ones_row, d * d, preferred_element_type=jnp.float32) * inv_nl
        scale = g * jax.lax.rsqrt(var + BN_EPS)
        return _leaky(d * scale + be)

    h = x_ref[...]                                   # (NL, Cpad) f32

    # conv_block1 (dilation = 1); trailing LeakyReLU matches `out_0 = self.relu(x0)`
    h = bn_leaky(conv(h, w1a, 1), g1a, be1a)
    h = bn_leaky(conv(h, w1b, 1), g1b, be1b)
    h = _leaky(h)

    # conv_block2 (dilation = 2); trailing LeakyReLU matches `out_1 = self.relu(x1)`
    h = bn_leaky(conv(h, w2a, 2), g2a, be2a)
    h = bn_leaky(conv(h, w2b, 2), g2b, be2b)
    h = _leaky(h)

    # Single lane-dense (multiple-of-128) block store of the whole output.
    out_ref[...] = h.astype(out_ref.dtype)


def tcn_forward(x, params, kernel_size=3):
    """x: (N, L, in_channels0) float32 -> (N, L, out_channels1) float32."""
    N, L, c_in = x.shape
    c_mid = params["w1a"].shape[2]
    c_out = params["w2b"].shape[2]
    NL = N * L
    CP = 128 * pl.cdiv(max(c_in, c_mid, c_out), 128)   # lane-pad all channel dims

    def prep_w(name):
        w = params[name]                               # (K, ci, co)
        k, ci, co = w.shape
        wp = jnp.zeros((k, CP, CP), jnp.float32).at[:, :ci, :co].set(w)
        return wp.astype(jnp.bfloat16)                 # MXU operands in bf16

    def prep_v(name):
        v = params[name]                               # (1, c)
        return jnp.zeros((1, CP), jnp.float32).at[:, :v.shape[1]].set(v)

    x_flat = jnp.zeros((NL, CP), jnp.float32).at[:, :c_in].set(x.reshape(NL, c_in))

    args = [x_flat,
            prep_w("w1a"), prep_v("g1a"), prep_v("be1a"),
            prep_w("w1b"), prep_v("g1b"), prep_v("be1b"),
            prep_w("w2a"), prep_v("g2a"), prep_v("be2a"),
            prep_w("w2b"), prep_v("g2b"), prep_v("be2b")]

    vmem = pl.BlockSpec(memory_space=pltpu.MemorySpace.VMEM)
    out_pad = pl.pallas_call(
        functools.partial(tcn_kernel, N, L, kernel_size),
        out_shape=jax.ShapeDtypeStruct((NL, CP), jnp.float32),
        in_specs=[vmem] * len(args),
        out_specs=vmem,
        compiler_params=pltpu.CompilerParams(vmem_limit_bytes=32 * 1024 * 1024),
    )(*args)
    return out_pad[:, :c_out].reshape(N, L, c_out)


def init_params(key, kernel_size, c_in, c_mid, c_out):
    def conv(k_, ksz, ci, co):
        kw, kb = jax.random.split(k_)
        bound = (ci * ksz) ** -0.5
        w = jax.random.uniform(kw, (ksz, ci, co), jnp.float32, -bound, bound)
        b = jax.random.uniform(kb, (1, co), jnp.float32, -bound, bound)
        return w, b

    def bn(k_, c):
        kg, kb = jax.random.split(k_)
        g = 1.0 + 0.1 * jax.random.normal(kg, (1, c), jnp.float32)
        be = 0.1 * jax.random.normal(kb, (1, c), jnp.float32)
        return g, be

    keys = jax.random.split(key, 8)
    p = {}
    p["w1a"], p["b1a"] = conv(keys[0], kernel_size, c_in, c_mid)
    p["g1a"], p["be1a"] = bn(keys[1], c_mid)
    p["w1b"], p["b1b"] = conv(keys[2], kernel_size, c_mid, c_mid)
    p["g1b"], p["be1b"] = bn(keys[3], c_mid)
    p["w2a"], p["b2a"] = conv(keys[4], kernel_size, c_mid, c_out)
    p["g2a"], p["be2a"] = bn(keys[5], c_out)
    p["w2b"], p["b2b"] = conv(keys[6], kernel_size, c_out, c_out)
    p["g2b"], p["be2b"] = bn(keys[7], c_out)
    return p


def ref_tcn(x, p, matmul_dtype=jnp.float32):
    """Pure-JAX reference.  matmul_dtype=bf16 mirrors the kernel's MXU operand cast."""
    def conv(h, w, b, d):
        K = w.shape[0]
        pad = (K - 1) * d
        L = h.shape[1]
        hp = jnp.pad(h, ((0, 0), (pad, 0), (0, 0)))
        y = jnp.zeros((h.shape[0], L, w.shape[2]), jnp.float32)
        for k in range(K):
            y = y + jnp.einsum("nlc,cd->nld",
                               hp[:, k * d:k * d + L, :].astype(matmul_dtype),
                               w[k].astype(matmul_dtype),
                               preferred_element_type=jnp.float32)
        return y + b[None]

    def bn(h, g, be):
        mean = h.mean(axis=(0, 1), keepdims=True)
        var = ((h - mean) ** 2).mean(axis=(0, 1), keepdims=True)
        return (h - mean) * g[None] / jnp.sqrt(var + BN_EPS) + be[None]

    h = x.astype(jnp.float32)
    h = _leaky(bn(conv(h, p["w1a"], p["b1a"], 1), p["g1a"], p["be1a"]))
    h = _leaky(bn(conv(h, p["w1b"], p["b1b"], 1), p["g1b"], p["be1b"]))
    h = _leaky(h)
    h = _leaky(bn(conv(h, p["w2a"], p["b2a"], 2), p["g2a"], p["be2a"]))
    h = _leaky(bn(conv(h, p["w2b"], p["b2b"], 2), p["g2b"], p["be2b"]))
    h = _leaky(h)
    return h


if __name__ == "__main__":
    kernel_size, stride = 3, 1
    N, L = 2, 16
    in_channels0, out_channels0, out_channels1 = 4, 8, 8

    key = jax.random.PRNGKey(0)
    kx, kp = jax.random.split(key)
    x = jax.random.normal(kx, (N, L, in_channels0), jnp.float32)
    params = init_params(kp, kernel_size, in_channels0, out_channels0, out_channels1)

    out = jax.block_until_ready(tcn_forward(x, params, kernel_size))
    assert out.shape == (N, L, out_channels1), out.shape

    # Logic check vs a reference whose matmul operands are also bf16 (tight).
    ref_b = ref_tcn(x, params, jnp.bfloat16)
    err_b = float(jnp.max(jnp.abs(out - ref_b)))
    assert err_b < 2e-2, f"max abs err vs bf16-matmul ref {err_b}"

    # Semantics check vs the full-f32 PyTorch-equivalent math (bounds bf16 drift).
    ref_f = ref_tcn(x, params, jnp.float32)
    err_f = float(jnp.max(jnp.abs(out - ref_f)))
    assert err_f < 1e-1, f"max abs err vs f32 ref {err_f}"

    print("KERNEL_OK")
</pallas_src>

<mosaic_0001>
module attributes {stable_mosaic.version = 11 : i64} {
  func.func @tcn_kernel(%arg0: memref<32x128xf32, #tpu.memory_space<vmem>>, %arg1: memref<3x128x128xbf16, #tpu.memory_space<vmem>>, %arg2: memref<1x128xf32, #tpu.memory_space<vmem>>, %arg3: memref<1x128xf32, #tpu.memory_space<vmem>>, %arg4: memref<3x128x128xbf16, #tpu.memory_space<vmem>>, %arg5: memref<1x128xf32, #tpu.memory_space<vmem>>, %arg6: memref<1x128xf32, #tpu.memory_space<vmem>>, %arg7: memref<3x128x128xbf16, #tpu.memory_space<vmem>>, %arg8: memref<1x128xf32, #tpu.memory_space<vmem>>, %arg9: memref<1x128xf32, #tpu.memory_space<vmem>>, %arg10: memref<3x128x128xbf16, #tpu.memory_space<vmem>>, %arg11: memref<1x128xf32, #tpu.memory_space<vmem>>, %arg12: memref<1x128xf32, #tpu.memory_space<vmem>>, %arg13: memref<32x128xf32, #tpu.memory_space<vmem>>) attributes {dimension_semantics = [], scalar_prefetch = 0 : i64, scratch_operands = 0 : i64, tpu.core_type = #tpu.core_type<tc>} {
    %0 = tpu.iota {dimensions = array<i32: 0>} : vector<32x1xi32>
    %c16_i32 = arith.constant 16 : i32
    %c0_i32 = arith.constant 0 : i32
    %1 = arith.cmpi eq, %c16_i32, %c0_i32 : i32
    %c1_i32 = arith.constant 1 : i32
    %2 = arith.select %1, %c1_i32, %c16_i32 : i32
    %3 = vector.broadcast %2 : i32 to vector<32x1xi32>
    %4 = arith.remsi %0, %3 : vector<32x1xi32>
    %c0_i32_0 = arith.constant 0 : i32
    %5 = vector.broadcast %c0_i32_0 : i32 to vector<32x1xi32>
    %6 = arith.cmpi ne, %4, %5 : vector<32x1xi32>
    %c0_i32_1 = arith.constant 0 : i32
    %7 = vector.broadcast %c0_i32_1 : i32 to vector<32x1xi32>
    %8 = arith.cmpi slt, %4, %7 : vector<32x1xi32>
    %c0_i32_2 = arith.constant 0 : i32
    %9 = arith.cmpi slt, %2, %c0_i32_2 : i32
    %10 = vector.broadcast %9 : i1 to vector<32x1xi1>
    %11 = vector.broadcast %10 : vector<32x1xi1> to vector<32x1xi1>
    %12 = arith.xori %8, %11 : vector<32x1xi1>
    %13 = arith.andi %12, %6 : vector<32x1xi1>
    %14 = vector.broadcast %2 : i32 to vector<32x1xi32>
    %15 = arith.addi %4, %14 : vector<32x1xi32>
    %16 = arith.select %13, %15, %4 : vector<32x1xi1>, vector<32x1xi32>
    %cst = arith.constant 1.000000e+00 : f32
    %17 = vector.broadcast %cst : f32 to vector<1x32xf32>
    %c0 = arith.constant 0 : index
    %c0_3 = arith.constant 0 : index
    %18 = vector.load %arg0[%c0, %c0_3] : memref<32x128xf32, #tpu.memory_space<vmem>>, vector<32x128xf32>
    %c2_i32 = arith.constant 2 : i32
    %19 = vector.broadcast %c2_i32 : i32 to vector<32x1xi32>
    %20 = arith.cmpi sge, %16, %19 : vector<32x1xi32>
    %c2_i32_4 = arith.constant 2 : i32
    %21 = tpu.dynamic_rotate %18 by %c2_i32_4 dim 0 : vector<32x128xf32>, i32 -> vector<32x128xf32>
    %cst_5 = arith.constant 0.000000e+00 : f32
    %22 = vector.shape_cast %20 : vector<32x1xi1> to vector<32x1xi1>
    %23 = vector.broadcast %22 : vector<32x1xi1> to vector<32x128xi1>
    %24 = vector.broadcast %cst_5 : f32 to vector<32x128xf32>
    %25 = arith.select %23, %21, %24 : vector<32x128xi1>, vector<32x128xf32>
    %26 = arith.truncf %25 : vector<32x128xf32> to vector<32x128xbf16>
    %c0_6 = arith.constant 0 : index
    %c0_7 = arith.constant 0 : index
    %c0_8 = arith.constant 0 : index
    %27 = vector.load %arg1[%c0_6, %c0_7, %c0_8] : memref<3x128x128xbf16, #tpu.memory_space<vmem>>, vector<1x128x128xbf16>
    %28 = vector.shape_cast %27 : vector<1x128x128xbf16> to vector<128x128xbf16>
    %cst_9 = arith.constant dense<0.000000e+00> : vector<32x128xf32>
    %29 = tpu.matmul %26, %28, %cst_9 {dimension_numbers = #tpu.dot_dimension_numbers<[1], [0], [0], [1], [0, 0, 1, 1], [], []>} : vector<32x128xbf16>, vector<128x128xbf16>, vector<32x128xf32> -> vector<32x128xf32>
    %c1_i32_10 = arith.constant 1 : i32
    %30 = vector.broadcast %c1_i32_10 : i32 to vector<32x1xi32>
    %31 = arith.cmpi sge, %16, %30 : vector<32x1xi32>
    %c1_i32_11 = arith.constant 1 : i32
    %32 = tpu.dynamic_rotate %18 by %c1_i32_11 dim 0 : vector<32x128xf32>, i32 -> vector<32x128xf32>
    %cst_12 = arith.constant 0.000000e+00 : f32
    %33 = vector.shape_cast %31 : vector<32x1xi1> to vector<32x1xi1>
    %34 = vector.broadcast %33 : vector<32x1xi1> to vector<32x128xi1>
    %35 = vector.broadcast %cst_12 : f32 to vector<32x128xf32>
    %36 = arith.select %34, %32, %35 : vector<32x128xi1>, vector<32x128xf32>
    %37 = arith.truncf %36 : vector<32x128xf32> to vector<32x128xbf16>
    %c1 = arith.constant 1 : index
    %c0_13 = arith.constant 0 : index
    %c0_14 = arith.constant 0 : index
    %38 = vector.load %arg1[%c1, %c0_13, %c0_14] : memref<3x128x128xbf16, #tpu.memory_space<vmem>>, vector<1x128x128xbf16>
    %39 = vector.shape_cast %38 : vector<1x128x128xbf16> to vector<128x128xbf16>
    %cst_15 = arith.constant dense<0.000000e+00> : vector<32x128xf32>
    %40 = tpu.matmul %37, %39, %cst_15 {dimension_numbers = #tpu.dot_dimension_numbers<[1], [0], [0], [1], [0, 0, 1, 1], [], []>} : vector<32x128xbf16>, vector<128x128xbf16>, vector<32x128xf32> -> vector<32x128xf32>
    %41 = arith.addf %29, %40 : vector<32x128xf32>
    %42 = arith.truncf %18 : vector<32x128xf32> to vector<32x128xbf16>
    %c2 = arith.constant 2 : index
    %c0_16 = arith.constant 0 : index
    %c0_17 = arith.constant 0 : index
    %43 = vector.load %arg1[%c2, %c0_16, %c0_17] : memref<3x128x128xbf16, #tpu.memory_space<vmem>>, vector<1x128x128xbf16>
    %44 = vector.shape_cast %43 : vector<1x128x128xbf16> to vector<128x128xbf16>
    %cst_18 = arith.constant dense<0.000000e+00> : vector<32x128xf32>
    %45 = tpu.matmul %42, %44, %cst_18 {dimension_numbers = #tpu.dot_dimension_numbers<[1], [0], [0], [1], [0, 0, 1, 1], [], []>} : vector<32x128xbf16>, vector<128x128xbf16>, vector<32x128xf32> -> vector<32x128xf32>
    %46 = arith.addf %41, %45 : vector<32x128xf32>
    %c0_19 = arith.constant 0 : index
    %c0_20 = arith.constant 0 : index
    %47 = vector.load %arg2[%c0_19, %c0_20] : memref<1x128xf32, #tpu.memory_space<vmem>>, vector<1x128xf32>
    %c0_21 = arith.constant 0 : index
    %c0_22 = arith.constant 0 : index
    %48 = vector.load %arg3[%c0_21, %c0_22] : memref<1x128xf32, #tpu.memory_space<vmem>>, vector<1x128xf32>
    %cst_23 = arith.constant dense<0.000000e+00> : vector<1x128xf32>
    %49 = tpu.matmul %17, %46, %cst_23 {dimension_numbers = #tpu.dot_dimension_numbers<[1], [0], [0], [1], [0, 0, 1, 1], [], []>} : vector<1x32xf32>, vector<32x128xf32>, vector<1x128xf32> -> vector<1x128xf32>
    %cst_24 = arith.constant 3.125000e-02 : f32
    %50 = vector.broadcast %cst_24 : f32 to vector<1x128xf32>
    %51 = arith.mulf %49, %50 : vector<1x128xf32>
    %52 = vector.broadcast %51 : vector<1x128xf32> to vector<32x128xf32>
    %53 = arith.subf %46, %52 : vector<32x128xf32>
    %54 = arith.mulf %53, %53 : vector<32x128xf32>
    %cst_25 = arith.constant dense<0.000000e+00> : vector<1x128xf32>
    %55 = tpu.matmul %17, %54, %cst_25 {dimension_numbers = #tpu.dot_dimension_numbers<[1], [0], [0], [1], [0, 0, 1, 1], [], []>} : vector<1x32xf32>, vector<32x128xf32>, vector<1x128xf32> -> vector<1x128xf32>
    %cst_26 = arith.constant 3.125000e-02 : f32
    %56 = vector.broadcast %cst_26 : f32 to vector<1x128xf32>
    %57 = arith.mulf %55, %56 : vector<1x128xf32>
    %cst_27 = arith.constant 9.99999974E-6 : f32
    %58 = vector.broadcast %cst_27 : f32 to vector<1x128xf32>
    %59 = arith.addf %57, %58 : vector<1x128xf32>
    %60 = math.rsqrt %59 : vector<1x128xf32>
    %61 = arith.mulf %47, %60 : vector<1x128xf32>
    %62 = vector.broadcast %61 : vector<1x128xf32> to vector<32x128xf32>
    %63 = arith.mulf %53, %62 : vector<32x128xf32>
    %64 = vector.broadcast %48 : vector<1x128xf32> to vector<32x128xf32>
    %65 = arith.addf %63, %64 : vector<32x128xf32>
    %cst_28 = arith.constant 0.000000e+00 : f32
    %66 = vector.broadcast %cst_28 : f32 to vector<32x128xf32>
    %67 = arith.cmpf oge, %65, %66 : vector<32x128xf32>
    %cst_29 = arith.constant 0.00999999977 : f32
    %68 = vector.broadcast %cst_29 : f32 to vector<32x128xf32>
    %69 = arith.mulf %68, %65 : vector<32x128xf32>
    %70 = arith.select %67, %65, %69 : vector<32x128xi1>, vector<32x128xf32>
    %c2_i32_30 = arith.constant 2 : i32
    %71 = tpu.dynamic_rotate %70 by %c2_i32_30 dim 0 : vector<32x128xf32>, i32 -> vector<32x128xf32>
    %cst_31 = arith.constant 0.000000e+00 : f32
    %72 = vector.shape_cast %20 : vector<32x1xi1> to vector<32x1xi1>
    %73 = vector.broadcast %72 : vector<32x1xi1> to vector<32x128xi1>
    %74 = vector.broadcast %cst_31 : f32 to vector<32x128xf32>
    %75 = arith.select %73, %71, %74 : vector<32x128xi1>, vector<32x128xf32>
    %76 = arith.truncf %75 : vector<32x128xf32> to vector<32x128xbf16>
    %c0_32 = arith.constant 0 : index
    %c0_33 = arith.constant 0 : index
    %c0_34 = arith.constant 0 : index
    %77 = vector.load %arg4[%c0_32, %c0_33, %c0_34] : memref<3x128x128xbf16, #tpu.memory_space<vmem>>, vector<1x128x128xbf16>
    %78 = vector.shape_cast %77 : vector<1x128x128xbf16> to vector<128x128xbf16>
    %cst_35 = arith.constant dense<0.000000e+00> : vector<32x128xf32>
    %79 = tpu.matmul %76, %78, %cst_35 {dimension_numbers = #tpu.dot_dimension_numbers<[1], [0], [0], [1], [0, 0, 1, 1], [], []>} : vector<32x128xbf16>, vector<128x128xbf16>, vector<32x128xf32> -> vector<32x128xf32>
    %c1_i32_36 = arith.constant 1 : i32
    %80 = tpu.dynamic_rotate %70 by %c1_i32_36 dim 0 : vector<32x128xf32>, i32 -> vector<32x128xf32>
    %cst_37 = arith.constant 0.000000e+00 : f32
    %81 = vector.shape_cast %31 : vector<32x1xi1> to vector<32x1xi1>
    %82 = vector.broadcast %81 : vector<32x1xi1> to vector<32x128xi1>
    %83 = vector.broadcast %cst_37 : f32 to vector<32x128xf32>
    %84 = arith.select %82, %80, %83 : vector<32x128xi1>, vector<32x128xf32>
    %85 = arith.truncf %84 : vector<32x128xf32> to vector<32x128xbf16>
    %c1_38 = arith.constant 1 : index
    %c0_39 = arith.constant 0 : index
    %c0_40 = arith.constant 0 : index
    %86 = vector.load %arg4[%c1_38, %c0_39, %c0_40] : memref<3x128x128xbf16, #tpu.memory_space<vmem>>, vector<1x128x128xbf16>
    %87 = vector.shape_cast %86 : vector<1x128x128xbf16> to vector<128x128xbf16>
    %cst_41 = arith.constant dense<0.000000e+00> : vector<32x128xf32>
    %88 = tpu.matmul %85, %87, %cst_41 {dimension_numbers = #tpu.dot_dimension_numbers<[1], [0], [0], [1], [0, 0, 1, 1], [], []>} : vector<32x128xbf16>, vector<128x128xbf16>, vector<32x128xf32> -> vector<32x128xf32>
    %89 = arith.addf %79, %88 : vector<32x128xf32>
    %90 = arith.truncf %70 : vector<32x128xf32> to vector<32x128xbf16>
    %c2_42 = arith.constant 2 : index
    %c0_43 = arith.constant 0 : index
    %c0_44 = arith.constant 0 : index
    %91 = vector.load %arg4[%c2_42, %c0_43, %c0_44] : memref<3x128x128xbf16, #tpu.memory_space<vmem>>, vector<1x128x128xbf16>
    %92 = vector.shape_cast %91 : vector<1x128x128xbf16> to vector<128x128xbf16>
    %cst_45 = arith.constant dense<0.000000e+00> : vector<32x128xf32>
    %93 = tpu.matmul %90, %92, %cst_45 {dimension_numbers = #tpu.dot_dimension_numbers<[1], [0], [0], [1], [0, 0, 1, 1], [], []>} : vector<32x128xbf16>, vector<128x128xbf16>, vector<32x128xf32> -> vector<32x128xf32>
    %94 = arith.addf %89, %93 : vector<32x128xf32>
    %c0_46 = arith.constant 0 : index
    %c0_47 = arith.constant 0 : index
    %95 = vector.load %arg5[%c0_46, %c0_47] : memref<1x128xf32, #tpu.memory_space<vmem>>, vector<1x128xf32>
    %c0_48 = arith.constant 0 : index
    %c0_49 = arith.constant 0 : index
    %96 = vector.load %arg6[%c0_48, %c0_49] : memref<1x128xf32, #tpu.memory_space<vmem>>, vector<1x128xf32>
    %cst_50 = arith.constant dense<0.000000e+00> : vector<1x128xf32>
    %97 = tpu.matmul %17, %94, %cst_50 {dimension_numbers = #tpu.dot_dimension_numbers<[1], [0], [0], [1], [0, 0, 1, 1], [], []>} : vector<1x32xf32>, vector<32x128xf32>, vector<1x128xf32> -> vector<1x128xf32>
    %cst_51 = arith.constant 3.125000e-02 : f32
    %98 = vector.broadcast %cst_51 : f32 to vector<1x128xf32>
    %99 = arith.mulf %97, %98 : vector<1x128xf32>
    %100 = vector.broadcast %99 : vector<1x128xf32> to vector<32x128xf32>
    %101 = arith.subf %94, %100 : vector<32x128xf32>
    %102 = arith.mulf %101, %101 : vector<32x128xf32>
    %cst_52 = arith.constant dense<0.000000e+00> : vector<1x128xf32>
    %103 = tpu.matmul %17, %102, %cst_52 {dimension_numbers = #tpu.dot_dimension_numbers<[1], [0], [0], [1], [0, 0, 1, 1], [], []>} : vector<1x32xf32>, vector<32x128xf32>, vector<1x128xf32> -> vector<1x128xf32>
    %cst_53 = arith.constant 3.125000e-02 : f32
    %104 = vector.broadcast %cst_53 : f32 to vector<1x128xf32>
    %105 = arith.mulf %103, %104 : vector<1x128xf32>
    %cst_54 = arith.constant 9.99999974E-6 : f32
    %106 = vector.broadcast %cst_54 : f32 to vector<1x128xf32>
    %107 = arith.addf %105, %106 : vector<1x128xf32>
    %108 = math.rsqrt %107 : vector<1x128xf32>
    %109 = arith.mulf %95, %108 : vector<1x128xf32>
    %110 = vector.broadcast %109 : vector<1x128xf32> to vector<32x128xf32>
    %111 = arith.mulf %101, %110 : vector<32x128xf32>
    %112 = vector.broadcast %96 : vector<1x128xf32> to vector<32x128xf32>
    %113 = arith.addf %111, %112 : vector<32x128xf32>
    %cst_55 = arith.constant 0.000000e+00 : f32
    %114 = vector.broadcast %cst_55 : f32 to vector<32x128xf32>
    %115 = arith.cmpf oge, %113, %114 : vector<32x128xf32>
    %cst_56 = arith.constant 0.00999999977 : f32
    %116 = vector.broadcast %cst_56 : f32 to vector<32x128xf32>
    %117 = arith.mulf %116, %113 : vector<32x128xf32>
    %118 = arith.select %115, %113, %117 : vector<32x128xi1>, vector<32x128xf32>
    %cst_57 = arith.constant 0.000000e+00 : f32
    %119 = vector.broadcast %cst_57 : f32 to vector<32x128xf32>
    %120 = arith.cmpf oge, %118, %119 : vector<32x128xf32>
    %cst_58 = arith.constant 0.00999999977 : f32
    %121 = vector.broadcast %cst_58 : f32 to vector<32x128xf32>
    %122 = arith.mulf %121, %118 : vector<32x128xf32>
    %123 = arith.select %120, %118, %122 : vector<32x128xi1>, vector<32x128xf32>
    %c4_i32 = arith.constant 4 : i32
    %124 = vector.broadcast %c4_i32 : i32 to vector<32x1xi32>
    %125 = arith.cmpi sge, %16, %124 : vector<32x1xi32>
    %c4_i32_59 = arith.constant 4 : i32
    %126 = tpu.dynamic_rotate %123 by %c4_i32_59 dim 0 : vector<32x128xf32>, i32 -> vector<32x128xf32>
    %cst_60 = arith.constant 0.000000e+00 : f32
    %127 = vector.shape_cast %125 : vector<32x1xi1> to vector<32x1xi1>
    %128 = vector.broadcast %127 : vector<32x1xi1> to vector<32x128xi1>
    %129 = vector.broadcast %cst_60 : f32 to vector<32x128xf32>
    %130 = arith.select %128, %126, %129 : vector<32x128xi1>, vector<32x128xf32>
    %131 = arith.truncf %130 : vector<32x128xf32> to vector<32x128xbf16>
    %c0_61 = arith.constant 0 : index
    %c0_62 = arith.constant 0 : index
    %c0_63 = arith.constant 0 : index
    %132 = vector.load %arg7[%c0_61, %c0_62, %c0_63] : memref<3x128x128xbf16, #tpu.memory_space<vmem>>, vector<1x128x128xbf16>
    %133 = vector.shape_cast %132 : vector<1x128x128xbf16> to vector<128x128xbf16>
    %cst_64 = arith.constant dense<0.000000e+00> : vector<32x128xf32>
    %134 = tpu.matmul %131, %133, %cst_64 {dimension_numbers = #tpu.dot_dimension_numbers<[1], [0], [0], [1], [0, 0, 1, 1], [], []>} : vector<32x128xbf16>, vector<128x128xbf16>, vector<32x128xf32> -> vector<32x128xf32>
    %c2_i32_65 = arith.constant 2 : i32
    %135 = tpu.dynamic_rotate %123 by %c2_i32_65 dim 0 : vector<32x128xf32>, i32 -> vector<32x128xf32>
    %cst_66 = arith.constant 0.000000e+00 : f32
    %136 = vector.shape_cast %20 : vector<32x1xi1> to vector<32x1xi1>
    %137 = vector.broadcast %136 : vector<32x1xi1> to vector<32x128xi1>
    %138 = vector.broadcast %cst_66 : f32 to vector<32x128xf32>
    %139 = arith.select %137, %135, %138 : vector<32x128xi1>, vector<32x128xf32>
    %140 = arith.truncf %139 : vector<32x128xf32> to vector<32x128xbf16>
    %c1_67 = arith.constant 1 : index
    %c0_68 = arith.constant 0 : index
    %c0_69 = arith.constant 0 : index
    %141 = vector.load %arg7[%c1_67, %c0_68, %c0_69] : memref<3x128x128xbf16, #tpu.memory_space<vmem>>, vector<1x128x128xbf16>
    %142 = vector.shape_cast %141 : vector<1x128x128xbf16> to vector<128x128xbf16>
    %cst_70 = arith.constant dense<0.000000e+00> : vector<32x128xf32>
    %143 = tpu.matmul %140, %142, %cst_70 {dimension_numbers = #tpu.dot_dimension_numbers<[1], [0], [0], [1], [0, 0, 1, 1], [], []>} : vector<32x128xbf16>, vector<128x128xbf16>, vector<32x128xf32> -> vector<32x128xf32>
    %144 = arith.addf %134, %143 : vector<32x128xf32>
    %145 = arith.truncf %123 : vector<32x128xf32> to vector<32x128xbf16>
    %c2_71 = arith.constant 2 : index
    %c0_72 = arith.constant 0 : index
    %c0_73 = arith.constant 0 : index
    %146 = vector.load %arg7[%c2_71, %c0_72, %c0_73] : memref<3x128x128xbf16, #tpu.memory_space<vmem>>, vector<1x128x128xbf16>
    %147 = vector.shape_cast %146 : vector<1x128x128xbf16> to vector<128x128xbf16>
    %cst_74 = arith.constant dense<0.000000e+00> : vector<32x128xf32>
    %148 = tpu.matmul %145, %147, %cst_74 {dimension_numbers = #tpu.dot_dimension_numbers<[1], [0], [0], [1], [0, 0, 1, 1], [], []>} : vector<32x128xbf16>, vector<128x128xbf16>, vector<32x128xf32> -> vector<32x128xf32>
    %149 = arith.addf %144, %148 : vector<32x128xf32>
    %c0_75 = arith.constant 0 : index
    %c0_76 = arith.constant 0 : index
    %150 = vector.load %arg8[%c0_75, %c0_76] : memref<1x128xf32, #tpu.memory_space<vmem>>, vector<1x128xf32>
    %c0_77 = arith.constant 0 : index
    %c0_78 = arith.constant 0 : index
    %151 = vector.load %arg9[%c0_77, %c0_78] : memref<1x128xf32, #tpu.memory_space<vmem>>, vector<1x128xf32>
    %cst_79 = arith.constant dense<0.000000e+00> : vector<1x128xf32>
    %152 = tpu.matmul %17, %149, %cst_79 {dimension_numbers = #tpu.dot_dimension_numbers<[1], [0], [0], [1], [0, 0, 1, 1], [], []>} : vector<1x32xf32>, vector<32x128xf32>, vector<1x128xf32> -> vector<1x128xf32>
    %cst_80 = arith.constant 3.125000e-02 : f32
    %153 = vector.broadcast %cst_80 : f32 to vector<1x128xf32>
    %154 = arith.mulf %152, %153 : vector<1x128xf32>
    %155 = vector.broadcast %154 : vector<1x128xf32> to vector<32x128xf32>
    %156 = arith.subf %149, %155 : vector<32x128xf32>
    %157 = arith.mulf %156, %156 : vector<32x128xf32>
    %cst_81 = arith.constant dense<0.000000e+00> : vector<1x128xf32>
    %158 = tpu.matmul %17, %157, %cst_81 {dimension_numbers = #tpu.dot_dimension_numbers<[1], [0], [0], [1], [0, 0, 1, 1], [], []>} : vector<1x32xf32>, vector<32x128xf32>, vector<1x128xf32> -> vector<1x128xf32>
    %cst_82 = arith.constant 3.125000e-02 : f32
    %159 = vector.broadcast %cst_82 : f32 to vector<1x128xf32>
    %160 = arith.mulf %158, %159 : vector<1x128xf32>
    %cst_83 = arith.constant 9.99999974E-6 : f32
    %161 = vector.broadcast %cst_83 : f32 to vector<1x128xf32>
    %162 = arith.addf %160, %161 : vector<1x128xf32>
    %163 = math.rsqrt %162 : vector<1x128xf32>
    %164 = arith.mulf %150, %163 : vector<1x128xf32>
    %165 = vector.broadcast %164 : vector<1x128xf32> to vector<32x128xf32>
    %166 = arith.mulf %156, %165 : vector<32x128xf32>
    %167 = vector.broadcast %151 : vector<1x128xf32> to vector<32x128xf32>
    %168 = arith.addf %166, %167 : vector<32x128xf32>
    %cst_84 = arith.constant 0.000000e+00 : f32
    %169 = vector.broadcast %cst_84 : f32 to vector<32x128xf32>
    %170 = arith.cmpf oge, %168, %169 : vector<32x128xf32>
    %cst_85 = arith.constant 0.00999999977 : f32
    %171 = vector.broadcast %cst_85 : f32 to vector<32x128xf32>
    %172 = arith.mulf %171, %168 : vector<32x128xf32>
    %173 = arith.select %170, %168, %172 : vector<32x128xi1>, vector<32x128xf32>
    %c4_i32_86 = arith.constant 4 : i32
    %174 = tpu.dynamic_rotate %173 by %c4_i32_86 dim 0 : vector<32x128xf32>, i32 -> vector<32x128xf32>
    %cst_87 = arith.constant 0.000000e+00 : f32
    %175 = vector.shape_cast %125 : vector<32x1xi1> to vector<32x1xi1>
    %176 = vector.broadcast %175 : vector<32x1xi1> to vector<32x128xi1>
    %177 = vector.broadcast %cst_87 : f32 to vector<32x128xf32>
    %178 = arith.select %176, %174, %177 : vector<32x128xi1>, vector<32x128xf32>
    %179 = arith.truncf %178 : vector<32x128xf32> to vector<32x128xbf16>
    %c0_88 = arith.constant 0 : index
    %c0_89 = arith.constant 0 : index
    %c0_90 = arith.constant 0 : index
    %180 = vector.load %arg10[%c0_88, %c0_89, %c0_90] : memref<3x128x128xbf16, #tpu.memory_space<vmem>>, vector<1x128x128xbf16>
    %181 = vector.shape_cast %180 : vector<1x128x128xbf16> to vector<128x128xbf16>
    %cst_91 = arith.constant dense<0.000000e+00> : vector<32x128xf32>
    %182 = tpu.matmul %179, %181, %cst_91 {dimension_numbers = #tpu.dot_dimension_numbers<[1], [0], [0], [1], [0, 0, 1, 1], [], []>} : vector<32x128xbf16>, vector<128x128xbf16>, vector<32x128xf32> -> vector<32x128xf32>
    %c2_i32_92 = arith.constant 2 : i32
    %183 = tpu.dynamic_rotate %173 by %c2_i32_92 dim 0 : vector<32x128xf32>, i32 -> vector<32x128xf32>
    %cst_93 = arith.constant 0.000000e+00 : f32
    %184 = vector.shape_cast %20 : vector<32x1xi1> to vector<32x1xi1>
    %185 = vector.broadcast %184 : vector<32x1xi1> to vector<32x128xi1>
    %186 = vector.broadcast %cst_93 : f32 to vector<32x128xf32>
    %187 = arith.select %185, %183, %186 : vector<32x128xi1>, vector<32x128xf32>
    %188 = arith.truncf %187 : vector<32x128xf32> to vector<32x128xbf16>
    %c1_94 = arith.constant 1 : index
    %c0_95 = arith.constant 0 : index
    %c0_96 = arith.constant 0 : index
    %189 = vector.load %arg10[%c1_94, %c0_95, %c0_96] : memref<3x128x128xbf16, #tpu.memory_space<vmem>>, vector<1x128x128xbf16>
    %190 = vector.shape_cast %189 : vector<1x128x128xbf16> to vector<128x128xbf16>
    %cst_97 = arith.constant dense<0.000000e+00> : vector<32x128xf32>
    %191 = tpu.matmul %188, %190, %cst_97 {dimension_numbers = #tpu.dot_dimension_numbers<[1], [0], [0], [1], [0, 0, 1, 1], [], []>} : vector<32x128xbf16>, vector<128x128xbf16>, vector<32x128xf32> -> vector<32x128xf32>
    %192 = arith.addf %182, %191 : vector<32x128xf32>
    %193 = arith.truncf %173 : vector<32x128xf32> to vector<32x128xbf16>
    %c2_98 = arith.constant 2 : index
    %c0_99 = arith.constant 0 : index
    %c0_100 = arith.constant 0 : index
    %194 = vector.load %arg10[%c2_98, %c0_99, %c0_100] : memref<3x128x128xbf16, #tpu.memory_space<vmem>>, vector<1x128x128xbf16>
    %195 = vector.shape_cast %194 : vector<1x128x128xbf16> to vector<128x128xbf16>
    %cst_101 = arith.constant dense<0.000000e+00> : vector<32x128xf32>
    %196 = tpu.matmul %193, %195, %cst_101 {dimension_numbers = #tpu.dot_dimension_numbers<[1], [0], [0], [1], [0, 0, 1, 1], [], []>} : vector<32x128xbf16>, vector<128x128xbf16>, vector<32x128xf32> -> vector<32x128xf32>
    %197 = arith.addf %192, %196 : vector<32x128xf32>
    %c0_102 = arith.constant 0 : index
    %c0_103 = arith.constant 0 : index
    %198 = vector.load %arg11[%c0_102, %c0_103] : memref<1x128xf32, #tpu.memory_space<vmem>>, vector<1x128xf32>
    %c0_104 = arith.constant 0 : index
    %c0_105 = arith.constant 0 : index
    %199 = vector.load %arg12[%c0_104, %c0_105] : memref<1x128xf32, #tpu.memory_space<vmem>>, vector<1x128xf32>
    %cst_106 = arith.constant dense<0.000000e+00> : vector<1x128xf32>
    %200 = tpu.matmul %17, %197, %cst_106 {dimension_numbers = #tpu.dot_dimension_numbers<[1], [0], [0], [1], [0, 0, 1, 1], [], []>} : vector<1x32xf32>, vector<32x128xf32>, vector<1x128xf32> -> vector<1x128xf32>
    %cst_107 = arith.constant 3.125000e-02 : f32
    %201 = vector.broadcast %cst_107 : f32 to vector<1x128xf32>
    %202 = arith.mulf %200, %201 : vector<1x128xf32>
    %203 = vector.broadcast %202 : vector<1x128xf32> to vector<32x128xf32>
    %204 = arith.subf %197, %203 : vector<32x128xf32>
    %205 = arith.mulf %204, %204 : vector<32x128xf32>
    %cst_108 = arith.constant dense<0.000000e+00> : vector<1x128xf32>
    %206 = tpu.matmul %17, %205, %cst_108 {dimension_numbers = #tpu.dot_dimension_numbers<[1], [0], [0], [1], [0, 0, 1, 1], [], []>} : vector<1x32xf32>, vector<32x128xf32>, vector<1x128xf32> -> vector<1x128xf32>
    %cst_109 = arith.constant 3.125000e-02 : f32
    %207 = vector.broadcast %cst_109 : f32 to vector<1x128xf32>
    %208 = arith.mulf %206, %207 : vector<1x128xf32>
    %cst_110 = arith.constant 9.99999974E-6 : f32
    %209 = vector.broadcast %cst_110 : f32 to vector<1x128xf32>
    %210 = arith.addf %208, %209 : vector<1x128xf32>
    %211 = math.rsqrt %210 : vector<1x128xf32>
    %212 = arith.mulf %198, %211 : vector<1x128xf32>
    %213 = vector.broadcast %212 : vector<1x128xf32> to vector<32x128xf32>
    %214 = arith.mulf %204, %213 : vector<32x128xf32>
    %215 = vector.broadcast %199 : vector<1x128xf32> to vector<32x128xf32>
    %216 = arith.addf %214, %215 : vector<32x128xf32>
    %cst_111 = arith.constant 0.000000e+00 : f32
    %217 = vector.broadcast %cst_111 : f32 to vector<32x128xf32>
    %218 = arith.cmpf oge, %216, %217 : vector<32x128xf32>
    %cst_112 = arith.constant 0.00999999977 : f32
    %219 = vector.broadcast %cst_112 : f32 to vector<32x128xf32>
    %220 = arith.mulf %219, %216 : vector<32x128xf32>
    %221 = arith.select %218, %216, %220 : vector<32x128xi1>, vector<32x128xf32>
    %cst_113 = arith.constant 0.000000e+00 : f32
    %222 = vector.broadcast %cst_113 : f32 to vector<32x128xf32>
    %223 = arith.cmpf oge, %221, %222 : vector<32x128xf32>
    %cst_114 = arith.constant 0.00999999977 : f32
    %224 = vector.broadcast %cst_114 : f32 to vector<32x128xf32>
    %225 = arith.mulf %224, %221 : vector<32x128xf32>
    %226 = arith.select %223, %221, %225 : vector<32x128xi1>, vector<32x128xf32>
    %c0_115 = arith.constant 0 : index
    %c0_116 = arith.constant 0 : index
    %227 = vector.load %arg13[%c0_115, %c0_116] : memref<32x128xf32, #tpu.memory_space<vmem>>, vector<32x128xf32>
    tpu.vector_store %arg13[%c0_115, %c0_116], %226 {strides = array<i32>} : memref<32x128xf32, #tpu.memory_space<vmem>>, vector<32x128xf32>,
    return
  }
}

</mosaic_0001>

<bundles_post_ra>
// kernel: tpu_custom_call.1
= control target key start
LH: loop header
LB: loop body
LE: loop exit
PB: predicated region body
PF: predicated region fallthrough
CT: control target
= control target key end

     0   :  { %18 = vsyncpa [#allocation3], 0  ;;  %s3977_s0 = inlined_call_operand.hbm [shape: f32[32,128], index: 0, kind: input, shape index: {}]   ;;  %s3978_s1 = inlined_call_operand.hbm [shape: bf16[3,128,128], index: 1, kind: input, shape index: {}]   ;;  %s3979_s2 = inlined_call_operand.vmem [shape: f32[1,128], index: 2, kind: input, shape index: {}]   ;;  %s3980_s3 = inlined_call_operand.vmem [shape: f32[1,128], index: 3, kind: input, shape index: {}]   ;;  %s3981_s4 = inlined_call_operand.hbm [shape: bf16[3,128,128], index: 4, kind: input, shape index: {}]   ;;  %s3982_s5 = inlined_call_operand.vmem [shape: f32[1,128], index: 5, kind: input, shape index: {}]   ;;  %s3983_s6 = inlined_call_operand.vmem [shape: f32[1,128], index: 6, kind: input, shape index: {}]   ;;  %s3984_s7 = inlined_call_operand.hbm [shape: bf16[3,128,128], index: 7, kind: input, shape index: {}]   ;;  %s3985_s8 = inlined_call_operand.vmem [shape: f32[1,128], index: 8, kind: input, shape index: {}]   ;;  %s3986_s9 = inlined_call_operand.vmem [shape: f32[1,128], index: 9, kind: input, shape index: {}]   ;;  %s3987_s10 = inlined_call_operand.hbm [shape: bf16[3,128,128], index: 10, kind: input, shape index: {}]   ;;  %s3988_s11 = inlined_call_operand.vmem [shape: f32[1,128], index: 11, kind: input, shape index: {}]   ;;  %s3989_s12 = inlined_call_operand.vmem [shape: f32[1,128], index: 12, kind: input, shape index: {}]   ;;  %s3990_s13 = inlined_call_operand.hbm [shape: f32[32,128], index: 13, kind: output, shape index: {}]  }
   0x1   :  { %19 = vsyncpa [#allocation6], 0 }
   0x2   :  { %20 = vsyncpa [#allocation9], 0 }
   0x3   :  { %21 = vsyncpa [#allocation4], 0  ;;  %s3508_s25 = smov [#allocation5]   ;;  %s3368_s29 = scalar_lea.hbm %s3978_s1, 3072 }
   0x4   :  { %s39_s26 = sshll.u32 %s3508_s25, 4  ;;  %p3369_p0 = scmp.ne.s32.totalorder %s3978_s1, %s3368_s29  ;;  %s40_s26 = int_to_ptr.vmem [resolvable:$true] %s39_s26 }
   0x5   :  { %p3372_p1 = scmp.lt.u32.totalorder %s3368_s29, %s3978_s1 }
   0x7   :  { %p3374_p2 = pnand %p3372_p1, %p3369_p0 }
   0x9   :  { %3377 = shalt.err (!%p3374_p2)
}
   0xa   :  { %s3378_s17 = scalar_lea.vmem %s40_s26, 3072  ;;  %p3383_p4 = scmp.lt.s32.totalorder %s40_s26, %s40_s26 }
   0xb   :  { %p3379_p3 = scmp.ne.s32.totalorder %s40_s26, %s3378_s17  ;;  %p3384_p5 = scmp.lt.s32.totalorder %s3378_s17, %s3378_s17 }
   0xd   :  { %p3385_p6 = por %p3384_p5, %p3383_p4 }
   0xf   :  { %p3386_p7 = pnand %p3385_p6, %p3379_p3 }
  0x11   :  { %3389 = shalt.err (!%p3386_p7)
}
  0x12   :  { %s3509_s18 = smov 64   ;;  %s3510_s19 = smov 4  }
  0x13   :  { %45 = dma.hbm_to_vmem [thread:$0]  %s3978_s1, 3072, %s40_s26, [#allocation6], %s3509_s18, %s3509_s18, %s3510_s19  }
  0x14   :  { %s3511_s22 = smov [#allocation8]   ;;  %s3512_s24 = smov [#allocation2]  }
  0x15   :  { %s71_s23 = sshll.u32 %s3511_s22, 4  ;;  %s27_s25 = sshll.u32 %s3512_s24, 4  ;;  %s72_s23 = int_to_ptr.vmem [resolvable:$true] %s71_s23  ;;  %s28_s25 = int_to_ptr.vmem [resolvable:$true] %s27_s25 }
  0x16   :  { %s3390_s29 = scalar_lea.hbm %s3984_s7, 3072 }
  0x17   :  { %p3391_p8 = scmp.ne.s32.totalorder %s3984_s7, %s3390_s29  ;;  %p3394_p9 = scmp.lt.u32.totalorder %s3390_s29, %s3984_s7 }
  0x19   :  { %p3396_p10 = pnand %p3394_p9, %p3391_p8 }
  0x1b   :  { %3399 = shalt.err (!%p3396_p10)
}
  0x1c   :  { %s3400_s1 = scalar_lea.vmem %s72_s23, 3072  ;;  %p3405_p12 = scmp.lt.s32.totalorder %s72_s23, %s72_s23 }
  0x1d   :  { %p3401_p11 = scmp.ne.s32.totalorder %s72_s23, %s3400_s1  ;;  %p3406_p13 = scmp.lt.s32.totalorder %s3400_s1, %s3400_s1 }
  0x1f   :  { %p3407_p0 = por %p3406_p13, %p3405_p12 }
  0x21   :  { %p3408_p1 = pnand %p3407_p0, %p3401_p11 }
  0x23   :  { %3411 = shalt.err (!%p3408_p1)
}
  0x24   :  { %77 = dma.hbm_to_vmem [thread:$0]  %s3984_s7, 3072, %s72_s23, [#allocation9], %s3509_s18, %s3509_s18, %s3510_s19  }
  0x25   :  { %s3412_s22 = scalar_lea.hbm %s3977_s0, 512 }
  0x26   :  { %p3413_p2 = scmp.ne.s32.totalorder %s3977_s0, %s3412_s22  ;;  %p3416_p3 = scmp.lt.u32.totalorder %s3412_s22, %s3977_s0 }
  0x28   :  { %p3418_p4 = pnand %p3416_p3, %p3413_p2 }
  0x2a   :  { %3421 = shalt.err (!%p3418_p4)
}
  0x2b   :  { %s3422_s30 = scalar_lea.vmem %s28_s25, 512  ;;  %p3427_p6 = scmp.lt.s32.totalorder %s28_s25, %s28_s25 }
  0x2c   :  { %p3423_p5 = scmp.ne.s32.totalorder %s28_s25, %s3422_s30  ;;  %p3428_p7 = scmp.lt.s32.totalorder %s3422_s30, %s3422_s30 }
  0x2e   :  { %p3429_p8 = por %p3428_p7, %p3427_p6 }
  0x30   :  { %p3430_p9 = pnand %p3429_p8, %p3423_p5 }
  0x32   :  { %3433 = shalt.err (!%p3430_p9)
}
  0x33   :  { %s3513_s7 = smov 128   ;;  %s3514_s23 = smov 8  }
  0x34   :  { %33 = dma.hbm_to_vmem [thread:$0]  %s3977_s0, 512, %s28_s25, [#allocation3], %s3513_s7, %s3513_s7, %s3514_s23  }
  0x35   :  { %s3515_s16 = smov [#allocation7]   ;;  %s3516_s26 = smov [#allocation10]  }
  0x36   :  { %s55_s1 = sshll.u32 %s3515_s16, 4  ;;  %s87_s17 = sshll.u32 %s3516_s26, 4  ;;  %s56_s1 = int_to_ptr.vmem [resolvable:$true] %s55_s1  ;;  %s88_s17 = int_to_ptr.vmem [resolvable:$true] %s87_s17 }
  0x37   :  { %s3434_s22 = scalar_lea.hbm %s3981_s4, 3072 }
  0x38   :  { %p3435_p10 = scmp.ne.s32.totalorder %s3981_s4, %s3434_s22  ;;  %p3438_p11 = scmp.lt.u32.totalorder %s3434_s22, %s3981_s4 }
  0x3a   :  { %p3440_p12 = pnand %p3438_p11, %p3435_p10 }
  0x3c   :  { %3443 = shalt.err (!%p3440_p12)
}
  0x3d   :  { %s3444_s0 = scalar_lea.vmem %s56_s1, 3072  ;;  %p3449_p0 = scmp.lt.s32.totalorder %s56_s1, %s56_s1 }
  0x3e   :  { %p3445_p13 = scmp.ne.s32.totalorder %s56_s1, %s3444_s0  ;;  %p3450_p1 = scmp.lt.s32.totalorder %s3444_s0, %s3444_s0 }
  0x40   :  { %p3451_p2 = por %p3450_p1, %p3449_p0 }
  0x42   :  { %p3452_p3 = pnand %p3451_p2, %p3445_p13 }
  0x44   :  { %3455 = shalt.err (!%p3452_p3)
}
  0x45   :  { %61 = dma.hbm_to_vmem [thread:$0]  %s3981_s4, 3072, %s56_s1, [#allocation6], %s3509_s18, %s3509_s18, %s3510_s19  }
  0x46   :  { %s3456_s16 = scalar_lea.hbm %s3987_s10, 3072 }
  0x47   :  { %p3457_p4 = scmp.ne.s32.totalorder %s3987_s10, %s3456_s16  ;;  %p3460_p5 = scmp.lt.u32.totalorder %s3456_s16, %s3987_s10 }
  0x49   :  { %p3462_p6 = pnand %p3460_p5, %p3457_p4 }
  0x4b   :  { %3465 = shalt.err (!%p3462_p6)
}
  0x4c   :  { %s3466_s24 = scalar_lea.vmem %s88_s17, 3072  ;;  %p3471_p8 = scmp.lt.s32.totalorder %s88_s17, %s88_s17 }
  0x4d   :  { %p3467_p7 = scmp.ne.s32.totalorder %s88_s17, %s3466_s24  ;;  %p3472_p9 = scmp.lt.s32.totalorder %s3466_s24, %s3466_s24 }
  0x4f   :  { %p3473_p10 = por %p3472_p9, %p3471_p8 }
  0x51   :  { %p3474_p11 = pnand %p3473_p10, %p3467_p7 }
  0x53   :  { %3477 = shalt.err (!%p3474_p11)
}
  0x54   :  { %93 = dma.hbm_to_vmem [thread:$0]  %s3987_s10, 3072, %s88_s17, [#allocation9], %s3509_s18, %s3509_s18, %s3510_s19  }
  0x55   :  { %3500 = dma.done.wait [#allocation3], 512  }
  0x56   :  { %3501 = vsyncadd [#allocation3], 4294966784 }
  0x57   :  { %3502 = dma.done.wait [#allocation6], 6144  }
  0x58   :  { %3503 = vsyncadd [#allocation6], 4294961152 }
  0x59   :  { %3504 = dma.done.wait [#allocation9], 6144  }
  0x5a   :  { %3505 = vsyncadd [#allocation9], 4294961152  ;;  %v114_v0 = vlaneseq  ;;  %v3264_v1 = vld [vmem:[#allocation5 + $0x40] sm:$0xff]   ;;  %v3265_v2 = vld [vmem:[#allocation5 + $0x48] sm:$0xff]   ;;  %vm3517_vm2 = vmmov 1   ;;  %v3518_v59 = vmov 0.0|0.0  }
  0x5b   :  { %2841 = vmatprep.subr.bf16.mxu0 %v3264_v1  ;;  %v3266_v4 = vld [vmem:[#allocation5 + $0x50] sm:$0xff]   ;;  %v3267_v6 = vld [vmem:[#allocation5 + $0x58] sm:$0xff]   ;;  %v3673_v7 = vld [vmem:[#allocation2] sm:$0xff]  ;;  %3169 = vmatprep.subr.bf16.mxu1 %v3518_v59  ;;  %vm3519_vm11 = vmmov 0   ;;  %v3520_v60 = vmov 0.0   ;;  %vm574_vm12 = vcmask 261120  }
  0x5c   :  { %v3668_v3 = vshrl.u32 %v114_v0, 7  ;;  %2842 = vmatpush3.bf16.msra.mxu0 %v3264_v1  ;;  %v3675_v8 = vld [vmem:[#allocation2 + $0x8] sm:$0xff]  ;;  %v3677_v9 = vld [vmem:[#allocation2 + $0x18] sm:$0xff]  ;;  %v218_v10 = vrot.slane %v3673_v7, 7  ;;  %v3268_v11 = vld [vmem:[#allocation5 + $0x60] sm:$0xff]   ;;  %v175_v25 = vrot.slane %v3673_v7, 6  ;;  %2909 = vmatprep.mubr.msk.f32.mxu1 %vm3519_vm11, %v3520_v60 }
  0x5d   :  { %2843 = vmatprep.subr.bf16.mxu0 %v3265_v2  ;;  %v219_v12 = vrot.slane %v3675_v8, 7  ;;  %v221_v13 = vrot.slane %v3677_v9, 7  ;;  %v3684_v14 = vld [vmem:[#allocation2 + $0x10] sm:$0xff]  ;;  %v3269_v21 = vld [vmem:[#allocation5 + $0x68] sm:$0xff]   ;;  %v3271_v24 = vld [vmem:[#allocation5 + $0x78] sm:$0xff]   ;;  %v176_v27 = vrot.slane %v3675_v8, 6  ;;  %v452_v52 = vpack.c.bf16 %v3675_v8, %v3673_v7 }
  0x5e   :  { %v3671_v5 = vand.u32 15, %v3668_v3  ;;  %vm222_vm1 = vcmp.lt.s32.totalorder %v3668_v3, 1  ;;  %v453_v18 = vpack.c.bf16 %v3677_v9, %v3684_v14  ;;  %v117_v20 = vadd.s32 16, %v3668_v3  ;;  %v3270_v23 = vld [vmem:[#allocation5 + $0x70] sm:$0xff]   ;;  %v3272_v30 = vld [vmem:[#allocation5] sm:$0xff]   ;;  %v3273_v38 = vld [vmem:[#allocation5 + $0x8] sm:$0xff]  }
  0x5f   :  { %v225_v15 = vsel %vm222_vm1, %v218_v10, %v219_v12  ;;  %v226_v16 = vsel %vm222_vm1, %v221_v13, %v218_v10  ;;  %v220_v26 = vrot.slane %v3684_v14, 7  ;;  %v178_v28 = vrot.slane %v3677_v9, 6  ;;  %v3274_v40 = vld [vmem:[#allocation5 + $0x10] sm:$0xff]   ;;  %v3275_v41 = vld [vmem:[#allocation5 + $0x18] sm:$0xff]   ;;  %v3276_v42 = vld [vmem:[#allocation5 + $0x20] sm:$0xff]  }
  0x60   :  { %2844 = vmatpush3.bf16.msra.mxu0 %v3265_v2  ;;  %vm214_vm0 = vcmp.ge.s32.totalorder %v3671_v5, 1  ;;  %v2534_v19 = vpack.c.bf16 %v225_v15, %v226_v16  ;;  %v3700_v22 = vand.u32 15, %v117_v20  ;;  %vm171_vm4 = vcmp.ge.s32.totalorder %v3671_v5, 2  ;;  %v3277_v43 = vld [vmem:[#allocation5 + $0x28] sm:$0xff]   ;;  %v3278_v44 = vld [vmem:[#allocation5 + $0x30] sm:$0xff]   ;;  %v3279_v45 = vld [vmem:[#allocation5 + $0x38] sm:$0xff]  }
  0x61   :  { %2845 = vmatprep.subr.bf16.mxu0 %v3266_v4  ;;  %vm3691_vm3 = vmpackc.low %vm3517_vm2, %vm214_vm0  ;;  %vm179_vm6 = vcmp.lt.s32.totalorder %v3668_v3, 2  ;;  %v177_v32 = vrot.slane %v3684_v14, 6  ;;  %v223_v33 = vsel %vm222_vm1, %v220_v26, %v221_v13  ;;  %v224_v34 = vsel %vm222_vm1, %v219_v12, %v220_v26  ;;  %v3280_v47 = vld [vmem:[#allocation5 + $0x80] sm:$0xff]   ;;  %v3281_v51 = vld [vmem:[#allocation5 + $0x88] sm:$0xff]  }
  0x62   :  { %2857 = vmatprep.mubr.msk.bf16.mxu0 %vm3691_vm3, %v2534_v19  ;;  %vm216_vm5 = vcmp.ge.s32.totalorder %v3700_v22, 1  ;;  %vm3715_vm8 = vmpackc.low %vm3517_vm2, %vm171_vm4  ;;  %v182_v35 = vsel %vm179_vm6, %v175_v25, %v176_v27  ;;  %v183_v36 = vsel %vm179_vm6, %v178_v28, %v175_v25  ;;  %v2537_v37 = vpack.c.bf16 %v223_v33, %v224_v34  ;;  %v3282_v53 = vld [vmem:[#allocation5 + $0x90] sm:$0xff]   ;;  %v3283_v54 = vld [vmem:[#allocation5 + $0x98] sm:$0xff]  }
  0x63   :  { %vm3710_vm7 = vmpackc.low %vm3517_vm2, %vm216_vm5  ;;  %v2548_v39 = vpack.c.bf16 %v182_v35, %v183_v36  ;;  %vm173_vm9 = vcmp.ge.s32.totalorder %v3700_v22, 2  ;;  %v180_v48 = vsel %vm179_vm6, %v177_v32, %v178_v28  ;;  %v181_v49 = vsel %vm179_vm6, %v176_v27, %v177_v32  ;;  %v3284_v55 = vld [vmem:[#allocation5 + $0xa0] sm:$0xff]   ;;  %v3285_v56 = vld [vmem:[#allocation5 + $0xa8] sm:$0xff]  }
  0x64   :  { %2846 = vmatpush3.bf16.msra.mxu0 %v3266_v4  ;;  %vm3734_vm10 = vmpackc.low %vm3517_vm2, %vm173_vm9  ;;  %v2551_v50 = vpack.c.bf16 %v180_v48, %v181_v49  ;;  %v3286_v57 = vld [vmem:[#allocation5 + $0xb0] sm:$0xff]   ;;  %v3287_v58 = vld [vmem:[#allocation5 + $0xb8] sm:$0xff]   ;;  %v3521_v4 = vmov 1.0  }
  0x65   :  { %2847 = vmatprep.subr.bf16.mxu0 %v3267_v6  ;;  %v3290_v25 = vld [vmem:[#allocation7 + $0x50] sm:$0xff]   ;;  %v3291_v26 = vld [vmem:[#allocation7 + $0x58] sm:$0xff]   ;;  %v3292_v27 = vld [vmem:[#allocation7 + $0x60] sm:$0xff]  }
  0x66   :  { %v3293_v28 = vld [vmem:[#allocation7 + $0x68] sm:$0xff]   ;;  %v3295_v32 = vld [vmem:[#allocation7 + $0x78] sm:$0xff]   ;;  %v3296_v33 = vld [vmem:[#allocation7] sm:$0xff]  }
  0x67   :  { %v3301_v17 = vld [vmem:[#allocation7 + $0x28] sm:$0xff]   ;;  %v3303_v29 = vld [vmem:[#allocation7 + $0x38] sm:$0xff]  }
  0x68   :  { %2848 = vmatpush3.bf16.msra.mxu0 %v3267_v6  ;;  %v3762_v6 = vsub.s32 0, %v3668_v3  ;;  %v3349_v31 = vld [vmem:[#allocation10 + $0x28] sm:$0xff]   ;;  %v3351_v46 = vld [vmem:[#allocation10 + $0x38] sm:$0xff]  }
  0x69   :  { %2849 = vmatprep.subr.bf16.mxu0 %v3268_v11 }
  0x6c   :  { %2850 = vmatpush3.bf16.msra.mxu0 %v3268_v11 }
  0x6d   :  { %2851 = vmatprep.subr.bf16.mxu0 %v3269_v21 }
  0x70   :  { %2852 = vmatpush3.bf16.msra.mxu0 %v3269_v21 }
  0x71   :  { %2853 = vmatprep.subr.bf16.mxu0 %v3270_v23 }
  0x74   :  { %2854 = vmatpush3.bf16.msra.mxu0 %v3270_v23  ;;  %v3288_v23 = vld [vmem:[#allocation7 + $0x40] sm:$0xff]  }
  0x75   :  { %2855 = vmatprep.subr.bf16.mxu0 %v3271_v24 }
  0x78   :  { %2856 = vmatpush3.bf16.msra.mxu0 %v3271_v24  ;;  %v3289_v24 = vld [vmem:[#allocation7 + $0x48] sm:$0xff]  }
  0x79   :  { %2861 = vmatprep.subr.bf16.mxu0 %v3272_v30 }
  0x7b   :  { %2858 = vmatmul.mubr.msk.bf16.vlgmr.msra.gmra.mrb[0].mxu0 %vm3710_vm7, %v2537_v37 }
  0x7c   :  { %2862 = vmatpush3.bf16.msra.mxu0 %v3272_v30  ;;  %2877 = vmatprep.mubr.msk.bf16.mxu0 %vm3715_vm8, %v2548_v39  ;;  %v3294_v30 = vld [vmem:[#allocation7 + $0x70] sm:$0xff]  }
  0x7d   :  { %2863 = vmatprep.subr.bf16.mxu0 %v3273_v38 }
  0x80   :  { %2864 = vmatpush3.bf16.msra.mxu0 %v3273_v38  ;;  %v572_v38 = vld [vmem:[%s3979_s2] sm:$0x1] }
  0x81   :  { %2865 = vmatprep.subr.bf16.mxu0 %v3274_v40 }
  0x84   :  { %2866 = vmatpush3.bf16.msra.mxu0 %v3274_v40 }
  0x85   :  { %2867 = vmatprep.subr.bf16.mxu0 %v3275_v41 }
  0x88   :  { %2868 = vmatpush3.bf16.msra.mxu0 %v3275_v41 }
  0x89   :  { %2869 = vmatprep.subr.bf16.mxu0 %v3276_v42 }
  0x8c   :  { %2870 = vmatpush3.bf16.msra.mxu0 %v3276_v42  ;;  %v2563_v42 = vld [vmem:[%s3980_s3] ss:$0 sm:$0xff] }
  0x8d   :  { %2871 = vmatprep.subr.bf16.mxu0 %v3277_v43 }
  0x90   :  { %2872 = vmatpush3.bf16.msra.mxu0 %v3277_v43 }
  0x91   :  { %2873 = vmatprep.subr.bf16.mxu0 %v3278_v44 }
  0x94   :  { %2874 = vmatpush3.bf16.msra.mxu0 %v3278_v44 }
  0x95   :  { %2875 = vmatprep.subr.bf16.mxu0 %v3279_v45 }
  0x98   :  { %2876 = vmatpush3.bf16.msra.mxu0 %v3279_v45 }
  0x99   :  { %2881 = vmatprep.subr.bf16.mxu0 %v3280_v47 }
  0x9b   :  { %2878 = vmatmul.mubr.msk.bf16.vlgmr.msra.gmra.mrb[0].mxu0 %vm3734_vm10, %v2551_v50 }
  0x9c   :  { %2882 = vmatpush3.bf16.msra.mxu0 %v3280_v47  ;;  %2897 = vmatprep.mubr.bf16.mxu0 %v452_v52 }
  0x9d   :  { %2883 = vmatprep.subr.bf16.mxu0 %v3281_v51 }
  0xa0   :  { %2884 = vmatpush3.bf16.msra.mxu0 %v3281_v51 }
  0xa1   :  { %2885 = vmatprep.subr.bf16.mxu0 %v3282_v53 }
  0xa4   :  { %2886 = vmatpush3.bf16.msra.mxu0 %v3282_v53 }
  0xa5   :  { %2887 = vmatprep.subr.bf16.mxu0 %v3283_v54 }
  0xa8   :  { %2888 = vmatpush3.bf16.msra.mxu0 %v3283_v54 }
  0xa9   :  { %2889 = vmatprep.subr.bf16.mxu0 %v3284_v55 }
  0xac   :  { %2890 = vmatpush3.bf16.msra.mxu0 %v3284_v55 }
  0xad   :  { %2891 = vmatprep.subr.bf16.mxu0 %v3285_v56 }
  0xb0   :  { %2892 = vmatpush3.bf16.msra.mxu0 %v3285_v56 }
  0xb1   :  { %2893 = vmatprep.subr.bf16.mxu0 %v3286_v57 }
  0xb4   :  { %2894 = vmatpush3.bf16.msra.mxu0 %v3286_v57 }
  0xb5   :  { %2895 = vmatprep.subr.bf16.mxu0 %v3287_v58 }
  0xb8   :  { %2896 = vmatpush3.bf16.msra.mxu0 %v3287_v58 }
  0xb9   :  { %3181 = vmatprep.subr.bf16.mxu0 %v3518_v59 }
  0xbb   :  { %2898 = vmatmul.mubr.bf16.vlgmr.msra.gmra.mrb[0].mxu0 %v453_v18 }
  0xbc   :  { %2991 = vmatprep.mubr.msk.f32.mxu0 %vm3519_vm11, %v3520_v60 }
 0x18e   :  { %v2899_v61 = vpop.f32.mrb[0].mxu0 }
 0x18f   :  { %v553_v62 = vpop.f32.mrb[1].mxu0 }
 0x190   :  { %v2900_v63 = vpop.f32.mrb[2].mxu0 }
 0x191   :  { %v3173_v0 = vpack.c.bf16 %v2900_v63, %v2899_v61  ;;  %v556_v1 = vpop.f32.mrb[3].mxu0 }
 0x192   :  { %v3170_v2 = vpack.c.bf16 %v556_v1, %v553_v62 }
 0x194   :  { %3171 = vmatpush3.bf16.msra.mxu1 %v3170_v2 }
 0x195   :  { %3172 = vmatprep.subr.bf16.mxu1 %v3518_v59 }
 0x198   :  { %3174 = vmatpush3.bf16.msra.mxu1 %v3173_v0 }
 0x199   :  { %3175 = vmatprep.subr.bf16.mxu1 %v3518_v59 }
 0x19b   :  { %2910 = vmatmul.mubr.msk.f32.vlgmr.msra.gmra.mrb[0].mxu1 %vm574_vm12, %v3521_v4 }
 0x19c   :  { %2920 = vmatprep.mubr.msk.f32.mxu1 %vm3519_vm11, %v3520_v60 }
 0x26e   :  { %v644_v7 = vpop.f32.mrb[0].mxu1 }
 0x26f   :  { %v648_v8 = vmul.f32 0.03125, %v644_v7  ;;  %v2911_v9 = vpop.f32.mrb[1].mxu1 }
 0x271   :  { %v652_v10 = vrot.slane %v648_v8, %v3762_v6 }
 0x273   :  { %v653_v11 = vsub.f32 %v553_v62, %v652_v10  ;;  %v654_v12 = vsub.f32 %v556_v1, %v652_v10  ;;  %v655_v13 = vsub.f32 %v2899_v61, %v652_v10  ;;  %v656_v14 = vsub.f32 %v2900_v63, %v652_v10 }
 0x275   :  { %v657_v15 = vmul.f32 %v653_v11, %v653_v11  ;;  %v658_v16 = vmul.f32 %v654_v12, %v654_v12  ;;  %v659_v19 = vmul.f32 %v655_v13, %v655_v13  ;;  %v660_v20 = vmul.f32 %v656_v14, %v656_v14 }
 0x277   :  { %v3176_v18 = vpack.c.bf16 %v658_v16, %v657_v15  ;;  %v3179_v21 = vpack.c.bf16 %v660_v20, %v659_v19  ;;  %v3297_v19 = vld [vmem:[#allocation7 + $0x8] sm:$0xff]  }
 0x279   :  { %3177 = vmatpush3.bf16.msra.mxu1 %v3176_v18 }
 0x27a   :  { %3178 = vmatprep.subr.bf16.mxu1 %v3518_v59 }
 0x27d   :  { %3180 = vmatpush3.bf16.msra.mxu1 %v3179_v21  ;;  %v3298_v21 = vld [vmem:[#allocation7 + $0x10] sm:$0xff]  }
 0x27e   :  { %2923 = vmatprep.subr.bf16.mxu1 %v3288_v23 }
 0x280   :  { %2921 = vmatmul.mubr.msk.f32.vlgmr.msra.gmra.mrb[2].mxu1 %vm574_vm12, %v3521_v4 }
 0x281   :  { %2924 = vmatpush3.bf16.msra.mxu1 %v3288_v23  ;;  %v3299_v23 = vld [vmem:[#allocation7 + $0x18] sm:$0xff]  }
 0x282   :  { %2925 = vmatprep.subr.bf16.mxu1 %v3289_v24 }
 0x285   :  { %2926 = vmatpush3.bf16.msra.mxu1 %v3289_v24  ;;  %v3300_v24 = vld [vmem:[#allocation7 + $0x20] sm:$0xff]  }
 0x286   :  { %2927 = vmatprep.subr.bf16.mxu1 %v3290_v25 }
 0x289   :  { %2928 = vmatpush3.bf16.msra.mxu1 %v3290_v25  ;;  %v3302_v25 = vld [vmem:[#allocation7 + $0x30] sm:$0xff]  }
 0x28a   :  { %2929 = vmatprep.subr.bf16.mxu1 %v3291_v26 }
 0x28d   :  { %2930 = vmatpush3.bf16.msra.mxu1 %v3291_v26 }
 0x28e   :  { %2931 = vmatprep.subr.bf16.mxu1 %v3292_v27 }
 0x291   :  { %2932 = vmatpush3.bf16.msra.mxu1 %v3292_v27  ;;  %v3304_v27 = vld [vmem:[#allocation7 + $0x80] sm:$0xff]  }
 0x292   :  { %2933 = vmatprep.subr.bf16.mxu1 %v3293_v28 }
 0x295   :  { %2934 = vmatpush3.bf16.msra.mxu1 %v3293_v28 }
 0x296   :  { %2935 = vmatprep.subr.bf16.mxu1 %v3294_v30 }
 0x299   :  { %2936 = vmatpush3.bf16.msra.mxu1 %v3294_v30 }
 0x29a   :  { %2937 = vmatprep.subr.bf16.mxu1 %v3295_v32 }
 0x29d   :  { %2938 = vmatpush3.bf16.msra.mxu1 %v3295_v32 }
 0x29e   :  { %2943 = vmatprep.subr.bf16.mxu1 %v3296_v33 }
 0x353   :  { %v727_v34 = vpop.f32.mrb[2].mxu1 }
 0x354   :  { %v731_v35 = vmul.f32 0.03125, %v727_v34  ;;  %v2922_v36 = vpop.f32.mrb[3].mxu1 }
 0x355   :  { %v3307_v36 = vld [vmem:[#allocation7 + $0x98] sm:$0xff]  }
 0x356   :  { %v732_v37 = vadd.f32 1e-05, %v731_v35  ;;  %v3306_v35 = vld [vmem:[#allocation7 + $0x90] sm:$0xff]  }
 0x358   :  { %3360 = vrsqrt.f32 %v732_v37  ;;  %v3308_v37 = vld [vmem:[#allocation7 + $0xa0] sm:$0xff]  }
 0x362   :  { %v3361_v39 = vpop.eup %3360 }
 0x363   :  { %v734_v40 = vmul.f32 %v3361_v39, %v572_v38  ;;  %v3309_v38 = vld [vmem:[#allocation7 + $0xa8] sm:$0xff]   ;;  %v3310_v39 = vld [vmem:[#allocation7 + $0xb0] sm:$0xff]  }
 0x365   :  { %v739_v41 = vrot.slane %v734_v40, %v3762_v6  ;;  %v3311_v40 = vld [vmem:[#allocation7 + $0xb8] sm:$0xff]  }
 0x367   :  { %v743_v43 = vmul.f32 %v739_v41, %v655_v13  ;;  %v741_v44 = vmul.f32 %v739_v41, %v653_v11  ;;  %v742_v45 = vmul.f32 %v739_v41, %v654_v12  ;;  %v744_v47 = vmul.f32 %v739_v41, %v656_v14 }
 0x369   :  { %v751_v48 = vadd.f32 %v2563_v42, %v741_v44  ;;  %v752_v49 = vadd.f32 %v2563_v42, %v742_v45  ;;  %v754_v50 = vadd.f32 %v2563_v42, %v744_v47  ;;  %v753_v51 = vadd.f32 %v2563_v42, %v743_v43 }
 0x36b   :  { %vm755_vm13 = vcmp.ge.f32.partialorder %v751_v48, 0.0  ;;  %vm756_vm14 = vcmp.ge.f32.partialorder %v752_v49, 0.0  ;;  %vm758_vm15 = vcmp.ge.f32.partialorder %v754_v50, 0.0  ;;  %v759_v52 = vmul.f32 0.01, %v751_v48 }
 0x36c   :  { %v760_v53 = vmul.f32 0.01, %v752_v49  ;;  %v762_v54 = vmul.f32 0.01, %v754_v50  ;;  %vm757_vm0 = vcmp.ge.f32.partialorder %v753_v51, 0.0 }
 0x36d   :  { %v763_v55 = vsel %vm755_vm13, %v751_v48, %v759_v52  ;;  %v761_v56 = vmul.f32 0.01, %v753_v51 }
 0x36e   :  { %v764_v57 = vsel %vm756_vm14, %v752_v49, %v760_v53  ;;  %v3775_v58 = vsel %vm758_vm15, %v754_v50, %v762_v54  ;;  %v797_v61 = vrot.slane %v763_v55, 7  ;;  %v767_v62 = vrot.slane %v763_v55, 6 }
 0x36f   :  { %v798_v63 = vrot.slane %v764_v57, 7  ;;  %v800_v0 = vrot.slane %v3775_v58, 7  ;;  %v3778_v1 = vsel %vm757_vm0, %v753_v51, %v761_v56  ;;  %v768_v2 = vrot.slane %v764_v57, 6 }
 0x370   :  { %v799_v7 = vrot.slane %v3778_v1, 7  ;;  %v770_v8 = vrot.slane %v3775_v58, 6  ;;  %v1023_v12 = vpack.c.bf16 %v3775_v58, %v3778_v1  ;;  %v769_v26 = vrot.slane %v3778_v1, 6  ;;  %v3313_v1 = vld [vmem:[#allocation8 + $0x48] sm:$0xff]  }
 0x371   :  { %v803_v9 = vsel %vm222_vm1, %v797_v61, %v798_v63  ;;  %v804_v10 = vsel %vm222_vm1, %v800_v0, %v797_v61  ;;  %v773_v11 = vsel %vm179_vm6, %v767_v62, %v768_v2  ;;  %v1022_v34 = vpack.c.bf16 %v764_v57, %v763_v55 }
 0x372   :  { %v2573_v13 = vpack.c.bf16 %v803_v9, %v804_v10  ;;  %v801_v14 = vsel %vm222_vm1, %v799_v7, %v800_v0  ;;  %v802_v15 = vsel %vm222_vm1, %v798_v63, %v799_v7  ;;  %v774_v16 = vsel %vm179_vm6, %v770_v8, %v767_v62  ;;  %v3312_v0 = vld [vmem:[#allocation8 + $0x40] sm:$0xff]   ;;  %v3315_v7 = vld [vmem:[#allocation8 + $0x58] sm:$0xff]   ;;  %v3317_v9 = vld [vmem:[#allocation8 + $0x68] sm:$0xff]  }
 0x373   :  { %v2576_v18 = vpack.c.bf16 %v801_v14, %v802_v15  ;;  %v2587_v20 = vpack.c.bf16 %v773_v11, %v774_v16  ;;  %v771_v28 = vsel %vm179_vm6, %v769_v26, %v770_v8  ;;  %v772_v30 = vsel %vm179_vm6, %v768_v2, %v769_v26  ;;  %v3314_v2 = vld [vmem:[#allocation8 + $0x50] sm:$0xff]   ;;  %v3316_v8 = vld [vmem:[#allocation8 + $0x60] sm:$0xff]   ;;  %v3319_v11 = vld [vmem:[#allocation8 + $0x78] sm:$0xff]  }
 0x374   :  { %2939 = vmatprep.mubr.msk.bf16.mxu1 %vm3691_vm3, %v2573_v13  ;;  %v2590_v32 = vpack.c.bf16 %v771_v28, %v772_v30  ;;  %v3318_v10 = vld [vmem:[#allocation8 + $0x70] sm:$0xff]   ;;  %vm1353_vm15 = vcmp.lt.s32.totalorder %v3668_v3, 4  ;;  %vm1345_vm0 = vcmp.ge.s32.totalorder %v3671_v5, 4  ;;  %v3357_v3 = vld [vmem:[#allocation10 + $0xa8] sm:$0xff]  }
 0x375   :  { %2940 = vmatmul.mubr.msk.bf16.vlgmr.msra.gmra.mrb[4].mxu1 %vm3710_vm7, %v2576_v18  ;;  %v1142_v18 = vld [vmem:[%s3982_s5] sm:$0x1] }
 0x376   :  { %2944 = vmatpush3.bf16.msra.mxu1 %v3296_v33  ;;  %2959 = vmatprep.mubr.msk.bf16.mxu1 %vm3715_vm8, %v2587_v20  ;;  %v3305_v33 = vld [vmem:[#allocation7 + $0x88] sm:$0xff]  }
 0x377   :  { %2945 = vmatprep.subr.bf16.mxu1 %v3297_v19 }
 0x37a   :  { %2946 = vmatpush3.bf16.msra.mxu1 %v3297_v19 }
 0x37b   :  { %2947 = vmatprep.subr.bf16.mxu1 %v3298_v21 }
 0x37e   :  { %2948 = vmatpush3.bf16.msra.mxu1 %v3298_v21 }
 0x37f   :  { %2949 = vmatprep.subr.bf16.mxu1 %v3299_v23 }
 0x382   :  { %2950 = vmatpush3.bf16.msra.mxu1 %v3299_v23  ;;  %v2602_v23 = vld [vmem:[%s3983_s6] ss:$0 sm:$0xff] }
 0x383   :  { %2951 = vmatprep.subr.bf16.mxu1 %v3300_v24 }
 0x386   :  { %2952 = vmatpush3.bf16.msra.mxu1 %v3300_v24 }
 0x387   :  { %2953 = vmatprep.subr.bf16.mxu1 %v3301_v17 }
 0x38a   :  { %2954 = vmatpush3.bf16.msra.mxu1 %v3301_v17 }
 0x38b   :  { %2955 = vmatprep.subr.bf16.mxu1 %v3302_v25 }
 0x38e   :  { %2956 = vmatpush3.bf16.msra.mxu1 %v3302_v25 }
 0x38f   :  { %2957 = vmatprep.subr.bf16.mxu1 %v3303_v29 }
 0x392   :  { %2958 = vmatpush3.bf16.msra.mxu1 %v3303_v29 }
 0x393   :  { %2963 = vmatprep.subr.bf16.mxu1 %v3304_v27 }
 0x395   :  { %2960 = vmatmul.mubr.msk.bf16.vlgmr.msra.gmra.mrb[4].mxu1 %vm3734_vm10, %v2590_v32 }
 0x396   :  { %2964 = vmatpush3.bf16.msra.mxu1 %v3304_v27  ;;  %2979 = vmatprep.mubr.bf16.mxu1 %v1022_v34 }
 0x397   :  { %2965 = vmatprep.subr.bf16.mxu1 %v3305_v33 }
 0x39a   :  { %2966 = vmatpush3.bf16.msra.mxu1 %v3305_v33 }
 0x39b   :  { %2967 = vmatprep.subr.bf16.mxu1 %v3306_v35 }
 0x39e   :  { %2968 = vmatpush3.bf16.msra.mxu1 %v3306_v35 }
 0x39f   :  { %2969 = vmatprep.subr.bf16.mxu1 %v3307_v36 }
 0x3a2   :  { %2970 = vmatpush3.bf16.msra.mxu1 %v3307_v36 }
 0x3a3   :  { %2971 = vmatprep.subr.bf16.mxu1 %v3308_v37 }
 0x3a6   :  { %2972 = vmatpush3.bf16.msra.mxu1 %v3308_v37 }
 0x3a7   :  { %2973 = vmatprep.subr.bf16.mxu1 %v3309_v38 }
 0x3aa   :  { %2974 = vmatpush3.bf16.msra.mxu1 %v3309_v38 }
 0x3ab   :  { %2975 = vmatprep.subr.bf16.mxu1 %v3310_v39 }
 0x3ae   :  { %2976 = vmatpush3.bf16.msra.mxu1 %v3310_v39 }
 0x3af   :  { %2977 = vmatprep.subr.bf16.mxu1 %v3311_v40 }
 0x3b2   :  { %2978 = vmatpush3.bf16.msra.mxu1 %v3311_v40 }
 0x3b3   :  { %3193 = vmatprep.subr.bf16.mxu1 %v3518_v59 }
 0x3b5   :  { %2980 = vmatmul.mubr.bf16.vlgmr.msra.gmra.mrb[4].mxu1 %v1023_v12  ;;  %v3825_v12 = vld [vmem:[#allocation8] sm:$0xff]  }
 0x3b6   :  { %3073 = vmatprep.mubr.msk.f32.mxu1 %vm3519_vm11, %v3520_v60 }
 0x488   :  { %v2981_v41 = vpop.f32.mrb[4].mxu1 }
 0x489   :  { %v1123_v42 = vpop.f32.mrb[5].mxu1 }
 0x48a   :  { %v2982_v43 = vpop.f32.mrb[6].mxu1 }
 0x48b   :  { %v3185_v44 = vpack.c.bf16 %v2982_v43, %v2981_v41  ;;  %v1126_v45 = vpop.f32.mrb[7].mxu1 }
 0x48c   :  { %v3182_v47 = vpack.c.bf16 %v1126_v45, %v1123_v42 }
 0x48e   :  { %3183 = vmatpush3.bf16.msra.mxu0 %v3182_v47 }
 0x48f   :  { %3184 = vmatprep.subr.bf16.mxu0 %v3518_v59 }
 0x492   :  { %3186 = vmatpush3.bf16.msra.mxu0 %v3185_v44 }
 0x493   :  { %3187 = vmatprep.subr.bf16.mxu0 %v3518_v59 }
 0x495   :  { %2992 = vmatmul.mubr.msk.f32.vlgmr.msra.gmra.mrb[4].mxu0 %vm574_vm12, %v3521_v4 }
 0x496   :  { %3002 = vmatprep.mubr.msk.f32.mxu0 %vm3519_vm11, %v3520_v60 }
 0x568   :  { %v1210_v48 = vpop.f32.mrb[4].mxu0 }
 0x569   :  { %v1214_v49 = vmul.f32 0.03125, %v1210_v48  ;;  %v2993_v50 = vpop.f32.mrb[5].mxu0 }
 0x56b   :  { %v1218_v51 = vrot.slane %v1214_v49, %v3762_v6 }
 0x56d   :  { %v1219_v52 = vsub.f32 %v1123_v42, %v1218_v51  ;;  %v1220_v53 = vsub.f32 %v1126_v45, %v1218_v51  ;;  %v1221_v54 = vsub.f32 %v2981_v41, %v1218_v51  ;;  %v1222_v55 = vsub.f32 %v2982_v43, %v1218_v51 }
 0x56f   :  { %v1223_v56 = vmul.f32 %v1219_v52, %v1219_v52  ;;  %v1224_v57 = vmul.f32 %v1220_v53, %v1220_v53  ;;  %v1225_v61 = vmul.f32 %v1221_v54, %v1221_v54  ;;  %v1226_v62 = vmul.f32 %v1222_v55, %v1222_v55 }
 0x571   :  { %v3188_v58 = vpack.c.bf16 %v1224_v57, %v1223_v56  ;;  %v3191_v63 = vpack.c.bf16 %v1226_v62, %v1225_v61 }
 0x573   :  { %3189 = vmatpush3.bf16.msra.mxu0 %v3188_v58 }
 0x574   :  { %3190 = vmatprep.subr.bf16.mxu0 %v3518_v59 }
 0x577   :  { %3192 = vmatpush3.bf16.msra.mxu0 %v3191_v63 }
 0x578   :  { %3005 = vmatprep.subr.bf16.mxu0 %v3312_v0 }
 0x57a   :  { %3003 = vmatmul.mubr.msk.f32.vlgmr.msra.gmra.mrb[6].mxu0 %vm574_vm12, %v3521_v4 }
 0x57b   :  { %3006 = vmatpush3.bf16.msra.mxu0 %v3312_v0 }
 0x57c   :  { %3007 = vmatprep.subr.bf16.mxu0 %v3313_v1 }
 0x57f   :  { %3008 = vmatpush3.bf16.msra.mxu0 %v3313_v1 }
 0x580   :  { %3009 = vmatprep.subr.bf16.mxu0 %v3314_v2 }
 0x583   :  { %3010 = vmatpush3.bf16.msra.mxu0 %v3314_v2 }
 0x584   :  { %3011 = vmatprep.subr.bf16.mxu0 %v3315_v7 }
 0x587   :  { %3012 = vmatpush3.bf16.msra.mxu0 %v3315_v7  ;;  %v3321_v7 = vld [vmem:[#allocation8 + $0x8] sm:$0xff]  }
 0x588   :  { %3013 = vmatprep.subr.bf16.mxu0 %v3316_v8 }
 0x58b   :  { %3014 = vmatpush3.bf16.msra.mxu0 %v3316_v8 }
 0x58c   :  { %3015 = vmatprep.subr.bf16.mxu0 %v3317_v9 }
 0x58f   :  { %3016 = vmatpush3.bf16.msra.mxu0 %v3317_v9  ;;  %v3322_v9 = vld [vmem:[#allocation8 + $0x10] sm:$0xff]  }
 0x590   :  { %3017 = vmatprep.subr.bf16.mxu0 %v3318_v10 }
 0x593   :  { %3018 = vmatpush3.bf16.msra.mxu0 %v3318_v10  ;;  %v3323_v10 = vld [vmem:[#allocation8 + $0x18] sm:$0xff]  }
 0x594   :  { %3019 = vmatprep.subr.bf16.mxu0 %v3319_v11 }
 0x597   :  { %3020 = vmatpush3.bf16.msra.mxu0 %v3319_v11  ;;  %v3324_v11 = vld [vmem:[#allocation8 + $0x20] sm:$0xff]  }
 0x598   :  { %3025 = vmatprep.subr.bf16.mxu0 %v3825_v12 }
 0x64d   :  { %v1293_v13 = vpop.f32.mrb[6].mxu0 }
 0x64e   :  { %v1297_v14 = vmul.f32 0.03125, %v1293_v13  ;;  %v3004_v15 = vpop.f32.mrb[7].mxu0  ;;  %v3325_v13 = vld [vmem:[#allocation8 + $0x28] sm:$0xff]  }
 0x650   :  { %v1298_v16 = vadd.f32 1e-05, %v1297_v14  ;;  %v3326_v14 = vld [vmem:[#allocation8 + $0x30] sm:$0xff]  }
 0x652   :  { %3362 = vrsqrt.f32 %v1298_v16  ;;  %v3328_v16 = vld [vmem:[#allocation8 + $0x80] sm:$0xff]  }
 0x65c   :  { %v3363_v19 = vpop.eup %3362 }
 0x65d   :  { %v1300_v20 = vmul.f32 %v3363_v19, %v1142_v18 }
 0x65f   :  { %v1305_v21 = vrot.slane %v1300_v20, %v3762_v6  ;;  %v3359_v20 = vld [vmem:[#allocation10 + $0xb8] sm:$0xff]  }
 0x661   :  { %v1307_v24 = vmul.f32 %v1305_v21, %v1219_v52  ;;  %v1308_v17 = vmul.f32 %v1305_v21, %v1220_v53  ;;  %v1309_v25 = vmul.f32 %v1305_v21, %v1221_v54  ;;  %v1310_v29 = vmul.f32 %v1305_v21, %v1222_v55 }
 0x663   :  { %v1319_v26 = vadd.f32 %v2602_v23, %v1309_v25  ;;  %v1317_v27 = vadd.f32 %v2602_v23, %v1307_v24  ;;  %v1318_v28 = vadd.f32 %v2602_v23, %v1308_v17  ;;  %v1320_v30 = vadd.f32 %v2602_v23, %v1310_v29  ;;  %v3329_v23 = vld [vmem:[#allocation8 + $0x88] sm:$0xff]   ;;  %v3331_v17 = vld [vmem:[#allocation8 + $0x98] sm:$0xff]   ;;  %v3332_v25 = vld [vmem:[#allocation8 + $0xa0] sm:$0xff]  }
 0x664   :  { %v3333_v29 = vld [vmem:[#allocation8 + $0xa8] sm:$0xff]  }
 0x665   :  { %vm1321_vm1 = vcmp.ge.f32.partialorder %v1317_v27, 0.0  ;;  %vm1322_vm3 = vcmp.ge.f32.partialorder %v1318_v28, 0.0  ;;  %vm1324_vm4 = vcmp.ge.f32.partialorder %v1320_v30, 0.0  ;;  %v1325_v32 = vmul.f32 0.01, %v1317_v27 }
 0x666   :  { %v1326_v33 = vmul.f32 0.01, %v1318_v28  ;;  %v1328_v34 = vmul.f32 0.01, %v1320_v30  ;;  %vm1323_vm5 = vcmp.ge.f32.partialorder %v1319_v26, 0.0 }
 0x667   :  { %v1329_v35 = vsel %vm1321_vm1, %v1317_v27, %v1325_v32  ;;  %v1327_v36 = vmul.f32 0.01, %v1319_v26  ;;  %vm3865_vm1 = vmpackc.low %vm3517_vm2, %vm1345_vm0  ;;  %v3335_v27 = vld [vmem:[#allocation8 + $0xb8] sm:$0xff]  }
 0x668   :  { %v1330_v37 = vsel %vm1322_vm3, %v1318_v28, %v1326_v33  ;;  %v1332_v38 = vsel %vm1324_vm4, %v1320_v30, %v1328_v34  ;;  %vm1333_vm7 = vcmp.ge.f32.partialorder %v1329_v35, 0.0  ;;  %v1337_v39 = vmul.f32 0.01, %v1329_v35 }
 0x669   :  { %vm1334_vm9 = vcmp.ge.f32.partialorder %v1330_v37, 0.0  ;;  %vm1336_vm13 = vcmp.ge.f32.partialorder %v1332_v38, 0.0  ;;  %v1338_v40 = vmul.f32 0.01, %v1330_v37  ;;  %v1340_v41 = vmul.f32 0.01, %v1332_v38 }
 0x66a   :  { %v3835_v42 = vsel %vm1333_vm7, %v1329_v35, %v1337_v39  ;;  %v1331_v43 = vsel %vm1323_vm5, %v1319_v26, %v1327_v36  ;;  %vm1347_vm3 = vcmp.ge.s32.totalorder %v3700_v22, 4  ;;  %v3330_v22 = vld [vmem:[#allocation8 + $0x90] sm:$0xff]  }
 0x66b   :  { %v1342_v44 = vsel %vm1334_vm9, %v1330_v37, %v1338_v40  ;;  %v3837_v45 = vsel %vm1336_vm13, %v1332_v38, %v1340_v41  ;;  %v1388_v47 = vrot.slane %v3835_v42, 6  ;;  %vm1335_vm14 = vcmp.ge.f32.partialorder %v1331_v43, 0.0  ;;  %vm3881_vm4 = vmpackc.low %vm3517_vm2, %vm1347_vm3  ;;  %v3334_v26 = vld [vmem:[#allocation8 + $0xb0] sm:$0xff]  }
 0x66c   :  { %v1389_v48 = vrot.slane %v1342_v44, 6  ;;  %v1391_v49 = vrot.slane %v3837_v45, 6  ;;  %v1339_v50 = vmul.f32 0.01, %v1331_v43  ;;  %v1349_v51 = vrot.slane %v3835_v42, 4 }
 0x66d   :  { %v1350_v52 = vrot.slane %v1342_v44, 4  ;;  %v1352_v53 = vrot.slane %v3837_v45, 4  ;;  %v1613_v24 = vpack.c.bf16 %v1342_v44, %v3835_v42 }
 0x66e   :  { %v1394_v54 = vsel %vm179_vm6, %v1388_v47, %v1389_v48  ;;  %v1395_v55 = vsel %vm179_vm6, %v1391_v49, %v1388_v47  ;;  %v3848_v56 = vsel %vm1335_vm14, %v1331_v43, %v1339_v50 }
 0x66f   :  { %v2612_v57 = vpack.c.bf16 %v1394_v54, %v1395_v55  ;;  %v1390_v58 = vrot.slane %v3848_v56, 6  ;;  %v1356_v61 = vsel %vm1353_vm15, %v1349_v51, %v1350_v52  ;;  %v1357_v62 = vsel %vm1353_vm15, %v1352_v53, %v1349_v51  ;;  %v3336_v51 = vld [vmem:[#allocation10 + $0x40] sm:$0xff]   ;;  %v3339_v54 = vld [vmem:[#allocation10 + $0x58] sm:$0xff]  }
 0x670   :  { %v1614_v63 = vpack.c.bf16 %v3837_v45, %v3848_v56  ;;  %v2626_v8 = vpack.c.bf16 %v1356_v61, %v1357_v62  ;;  %v1351_v15 = vrot.slane %v3848_v56, 4  ;;  %v3340_v55 = vld [vmem:[#allocation10 + $0x60] sm:$0xff]   ;;  %v3341_v56 = vld [vmem:[#allocation10 + $0x68] sm:$0xff]  }
 0x671   :  { %3021 = vmatprep.mubr.msk.bf16.mxu0 %vm3715_vm8, %v2612_v57  ;;  %v1392_v0 = vsel %vm179_vm6, %v1390_v58, %v1391_v49  ;;  %v1393_v1 = vsel %vm179_vm6, %v1389_v48, %v1390_v58  ;;  %v3342_v57 = vld [vmem:[#allocation10 + $0x70] sm:$0xff]   ;;  %v3343_v58 = vld [vmem:[#allocation10 + $0x78] sm:$0xff]   ;;  %v3344_v61 = vld [vmem:[#allocation10] sm:$0xff]  }
 0x672   :  { %v2615_v2 = vpack.c.bf16 %v1392_v0, %v1393_v1  ;;  %v1354_v18 = vsel %vm1353_vm15, %v1351_v15, %v1352_v53  ;;  %v1355_v19 = vsel %vm1353_vm15, %v1350_v52, %v1351_v15  ;;  %v3337_v52 = vld [vmem:[#allocation10 + $0x48] sm:$0xff]   ;;  %v3338_v53 = vld [vmem:[#allocation10 + $0x50] sm:$0xff]  }
 0x673   :  { %v2629_v21 = vpack.c.bf16 %v1354_v18, %v1355_v19 }
 0x674   :  { %3022 = vmatmul.mubr.msk.bf16.vlgmr.msra.gmra.mrb[8].mxu0 %vm3734_vm10, %v2615_v2  ;;  %v1733_v2 = vld [vmem:[%s3985_s8] sm:$0x1] }
 0x675   :  { %3026 = vmatpush3.bf16.msra.mxu0 %v3825_v12  ;;  %3041 = vmatprep.mubr.msk.bf16.mxu0 %vm3865_vm1, %v2626_v8  ;;  %v3327_v12 = vld [vmem:[#allocation8 + $0x38] sm:$0xff]  }
 0x676   :  { %3027 = vmatprep.subr.bf16.mxu0 %v3321_v7 }
 0x679   :  { %3028 = vmatpush3.bf16.msra.mxu0 %v3321_v7 }
 0x67a   :  { %3029 = vmatprep.subr.bf16.mxu0 %v3322_v9 }
 0x67d   :  { %3030 = vmatpush3.bf16.msra.mxu0 %v3322_v9 }
 0x67e   :  { %3031 = vmatprep.subr.bf16.mxu0 %v3323_v10 }
 0x681   :  { %3032 = vmatpush3.bf16.msra.mxu0 %v3323_v10  ;;  %v2641_v10 = vld [vmem:[%s3986_s9] ss:$0 sm:$0xff] }
 0x682   :  { %3033 = vmatprep.subr.bf16.mxu0 %v3324_v11 }
 0x685   :  { %3034 = vmatpush3.bf16.msra.mxu0 %v3324_v11 }
 0x686   :  { %3035 = vmatprep.subr.bf16.mxu0 %v3325_v13 }
 0x689   :  { %3036 = vmatpush3.bf16.msra.mxu0 %v3325_v13 }
 0x68a   :  { %3037 = vmatprep.subr.bf16.mxu0 %v3326_v14 }
 0x68d   :  { %3038 = vmatpush3.bf16.msra.mxu0 %v3326_v14 }
 0x68e   :  { %3039 = vmatprep.subr.bf16.mxu0 %v3327_v12 }
 0x691   :  { %3040 = vmatpush3.bf16.msra.mxu0 %v3327_v12 }
 0x692   :  { %3045 = vmatprep.subr.bf16.mxu0 %v3328_v16 }
 0x694   :  { %3042 = vmatmul.mubr.msk.bf16.vlgmr.msra.gmra.mrb[8].mxu0 %vm3881_vm4, %v2629_v21 }
 0x695   :  { %3046 = vmatpush3.bf16.msra.mxu0 %v3328_v16  ;;  %3061 = vmatprep.mubr.bf16.mxu0 %v1613_v24 }
 0x696   :  { %3047 = vmatprep.subr.bf16.mxu0 %v3329_v23 }
 0x699   :  { %3048 = vmatpush3.bf16.msra.mxu0 %v3329_v23 }
 0x69a   :  { %3049 = vmatprep.subr.bf16.mxu0 %v3330_v22 }
 0x69d   :  { %3050 = vmatpush3.bf16.msra.mxu0 %v3330_v22 }
 0x69e   :  { %3051 = vmatprep.subr.bf16.mxu0 %v3331_v17 }
 0x6a1   :  { %3052 = vmatpush3.bf16.msra.mxu0 %v3331_v17 }
 0x6a2   :  { %3053 = vmatprep.subr.bf16.mxu0 %v3332_v25 }
 0x6a5   :  { %3054 = vmatpush3.bf16.msra.mxu0 %v3332_v25 }
 0x6a6   :  { %3055 = vmatprep.subr.bf16.mxu0 %v3333_v29 }
 0x6a9   :  { %3056 = vmatpush3.bf16.msra.mxu0 %v3333_v29 }
 0x6aa   :  { %3057 = vmatprep.subr.bf16.mxu0 %v3334_v26 }
 0x6ad   :  { %3058 = vmatpush3.bf16.msra.mxu0 %v3334_v26 }
 0x6ae   :  { %3059 = vmatprep.subr.bf16.mxu0 %v3335_v27 }
 0x6b1   :  { %3060 = vmatpush3.bf16.msra.mxu0 %v3335_v27 }
 0x6b2   :  { %3205 = vmatprep.subr.bf16.mxu0 %v3518_v59 }
 0x6b4   :  { %3062 = vmatmul.mubr.bf16.vlgmr.msra.gmra.mrb[8].mxu0 %v1614_v63 }
 0x6b5   :  { %3155 = vmatprep.mubr.msk.f32.mxu0 %vm3519_vm11, %v3520_v60 }
 0x787   :  { %v3063_v28 = vpop.f32.mrb[8].mxu0 }
 0x788   :  { %v1714_v30 = vpop.f32.mrb[9].mxu0 }
 0x789   :  { %v3064_v32 = vpop.f32.mrb[10].mxu0 }
 0x78a   :  { %v3197_v33 = vpack.c.bf16 %v3064_v32, %v3063_v28  ;;  %v1717_v34 = vpop.f32.mrb[11].mxu0 }
 0x78b   :  { %v3194_v35 = vpack.c.bf16 %v1717_v34, %v1714_v30 }
 0x78d   :  { %3195 = vmatpush3.bf16.msra.mxu1 %v3194_v35 }
 0x78e   :  { %3196 = vmatprep.subr.bf16.mxu1 %v3518_v59 }
 0x791   :  { %3198 = vmatpush3.bf16.msra.mxu1 %v3197_v33 }
 0x792   :  { %3199 = vmatprep.subr.bf16.mxu1 %v3518_v59 }
 0x794   :  { %3074 = vmatmul.mubr.msk.f32.vlgmr.msra.gmra.mrb[8].mxu1 %vm574_vm12, %v3521_v4 }
 0x795   :  { %3084 = vmatprep.mubr.msk.f32.mxu1 %vm3519_vm11, %v3520_v60 }
 0x867   :  { %v1801_v36 = vpop.f32.mrb[8].mxu1 }
 0x868   :  { %v1805_v37 = vmul.f32 0.03125, %v1801_v36  ;;  %v3075_v38 = vpop.f32.mrb[9].mxu1 }
 0x86a   :  { %v1809_v39 = vrot.slane %v1805_v37, %v3762_v6 }
 0x86c   :  { %v1810_v40 = vsub.f32 %v1714_v30, %v1809_v39  ;;  %v1811_v41 = vsub.f32 %v1717_v34, %v1809_v39  ;;  %v1812_v42 = vsub.f32 %v3063_v28, %v1809_v39  ;;  %v1813_v43 = vsub.f32 %v3064_v32, %v1809_v39 }
 0x86e   :  { %v1814_v44 = vmul.f32 %v1810_v40, %v1810_v40  ;;  %v1815_v45 = vmul.f32 %v1811_v41, %v1811_v41  ;;  %v1816_v48 = vmul.f32 %v1812_v42, %v1812_v42  ;;  %v1817_v49 = vmul.f32 %v1813_v43, %v1813_v43 }
 0x870   :  { %v3200_v47 = vpack.c.bf16 %v1815_v45, %v1814_v44  ;;  %v3203_v50 = vpack.c.bf16 %v1817_v49, %v1816_v48  ;;  %v3345_v45 = vld [vmem:[#allocation10 + $0x8] sm:$0xff]   ;;  %v3346_v48 = vld [vmem:[#allocation10 + $0x10] sm:$0xff]   ;;  %v3347_v49 = vld [vmem:[#allocation10 + $0x18] sm:$0xff]  }
 0x872   :  { %3201 = vmatpush3.bf16.msra.mxu1 %v3200_v47 }
 0x873   :  { %3202 = vmatprep.subr.bf16.mxu1 %v3518_v59 }
 0x876   :  { %3204 = vmatpush3.bf16.msra.mxu1 %v3203_v50  ;;  %v3348_v50 = vld [vmem:[#allocation10 + $0x20] sm:$0xff]  }
 0x877   :  { %3087 = vmatprep.subr.bf16.mxu1 %v3336_v51 }
 0x879   :  { %3085 = vmatmul.mubr.msk.f32.vlgmr.msra.gmra.mrb[10].mxu1 %vm574_vm12, %v3521_v4 }
 0x87a   :  { %3088 = vmatpush3.bf16.msra.mxu1 %v3336_v51  ;;  %v3350_v51 = vld [vmem:[#allocation10 + $0x30] sm:$0xff]  }
 0x87b   :  { %3089 = vmatprep.subr.bf16.mxu1 %v3337_v52 }
 0x87e   :  { %3090 = vmatpush3.bf16.msra.mxu1 %v3337_v52  ;;  %v3352_v52 = vld [vmem:[#allocation10 + $0x80] sm:$0xff]  }
 0x87f   :  { %3091 = vmatprep.subr.bf16.mxu1 %v3338_v53 }
 0x882   :  { %3092 = vmatpush3.bf16.msra.mxu1 %v3338_v53 }
 0x883   :  { %3093 = vmatprep.subr.bf16.mxu1 %v3339_v54 }
 0x886   :  { %3094 = vmatpush3.bf16.msra.mxu1 %v3339_v54 }
 0x887   :  { %3095 = vmatprep.subr.bf16.mxu1 %v3340_v55 }
 0x88a   :  { %3096 = vmatpush3.bf16.msra.mxu1 %v3340_v55 }
 0x88b   :  { %3097 = vmatprep.subr.bf16.mxu1 %v3341_v56 }
 0x88e   :  { %3098 = vmatpush3.bf16.msra.mxu1 %v3341_v56  ;;  %v3353_v56 = vld [vmem:[#allocation10 + $0x88] sm:$0xff]  }
 0x88f   :  { %3099 = vmatprep.subr.bf16.mxu1 %v3342_v57 }
 0x892   :  { %3100 = vmatpush3.bf16.msra.mxu1 %v3342_v57 }
 0x893   :  { %3101 = vmatprep.subr.bf16.mxu1 %v3343_v58 }
 0x896   :  { %3102 = vmatpush3.bf16.msra.mxu1 %v3343_v58  ;;  %v3354_v58 = vld [vmem:[#allocation10 + $0x90] sm:$0xff]  }
 0x897   :  { %3107 = vmatprep.subr.bf16.mxu1 %v3344_v61 }
 0x94c   :  { %v1884_v62 = vpop.f32.mrb[10].mxu1 }
 0x94d   :  { %v1888_v63 = vmul.f32 0.03125, %v1884_v62  ;;  %v3086_v0 = vpop.f32.mrb[11].mxu1  ;;  %v3356_v62 = vld [vmem:[#allocation10 + $0xa0] sm:$0xff]  }
 0x94f   :  { %v1889_v1 = vadd.f32 1e-05, %v1888_v63  ;;  %v3358_v63 = vld [vmem:[#allocation10 + $0xb0] sm:$0xff]  }
 0x951   :  { %3364 = vrsqrt.f32 %v1889_v1 }
 0x95b   :  { %v3365_v7 = vpop.eup %3364 }
 0x95c   :  { %v1891_v8 = vmul.f32 %v3365_v7, %v1733_v2 }
 0x95e   :  { %v1896_v9 = vrot.slane %v1891_v8, %v3762_v6 }
 0x960   :  { %v1900_v11 = vmul.f32 %v1896_v9, %v1812_v42  ;;  %v1898_v13 = vmul.f32 %v1896_v9, %v1810_v40  ;;  %v1899_v14 = vmul.f32 %v1896_v9, %v1811_v41  ;;  %v1901_v12 = vmul.f32 %v1896_v9, %v1813_v43 }
 0x962   :  { %v1908_v15 = vadd.f32 %v2641_v10, %v1898_v13  ;;  %v1909_v16 = vadd.f32 %v2641_v10, %v1899_v14  ;;  %v1911_v18 = vadd.f32 %v2641_v10, %v1901_v12  ;;  %v1910_v19 = vadd.f32 %v2641_v10, %v1900_v11 }
 0x964   :  { %vm1912_vm2 = vcmp.ge.f32.partialorder %v1908_v15, 0.0  ;;  %vm1913_vm5 = vcmp.ge.f32.partialorder %v1909_v16, 0.0  ;;  %vm1915_vm7 = vcmp.ge.f32.partialorder %v1911_v18, 0.0  ;;  %v1916_v21 = vmul.f32 0.01, %v1908_v15 }
 0x965   :  { %v1917_v23 = vmul.f32 0.01, %v1909_v16  ;;  %v1919_v24 = vmul.f32 0.01, %v1911_v18  ;;  %vm1914_vm9 = vcmp.ge.f32.partialorder %v1910_v19, 0.0 }
 0x966   :  { %v1920_v22 = vsel %vm1912_vm2, %v1908_v15, %v1916_v21  ;;  %v1918_v17 = vmul.f32 0.01, %v1910_v19 }
 0x967   :  { %v1921_v25 = vsel %vm1913_vm5, %v1909_v16, %v1917_v23  ;;  %v3911_v29 = vsel %vm1915_vm7, %v1911_v18, %v1919_v24  ;;  %v1954_v26 = vrot.slane %v1920_v22, 6  ;;  %v1924_v27 = vrot.slane %v1920_v22, 4 }
 0x968   :  { %v1955_v28 = vrot.slane %v1921_v25, 6  ;;  %v1957_v30 = vrot.slane %v3911_v29, 6  ;;  %v3914_v32 = vsel %vm1914_vm9, %v1910_v19, %v1918_v17  ;;  %v1925_v33 = vrot.slane %v1921_v25, 4 }
 0x969   :  { %v1956_v34 = vrot.slane %v3914_v32, 6  ;;  %v1927_v35 = vrot.slane %v3911_v29, 4  ;;  %v2180_v39 = vpack.c.bf16 %v3911_v29, %v3914_v32  ;;  %v1926_v5 = vrot.slane %v3914_v32, 4 }
 0x96a   :  { %v1960_v36 = vsel %vm179_vm6, %v1954_v26, %v1955_v28  ;;  %v1961_v37 = vsel %vm179_vm6, %v1957_v30, %v1954_v26  ;;  %v1930_v38 = vsel %vm1353_vm15, %v1924_v27, %v1925_v33  ;;  %v2179_v57 = vpack.c.bf16 %v1921_v25, %v1920_v22 }
 0x96b   :  { %v2651_v40 = vpack.c.bf16 %v1960_v36, %v1961_v37  ;;  %v1958_v41 = vsel %vm179_vm6, %v1956_v34, %v1957_v30  ;;  %v1959_v42 = vsel %vm179_vm6, %v1955_v28, %v1956_v34  ;;  %v1931_v43 = vsel %vm1353_vm15, %v1927_v35, %v1924_v27  ;;  %v2299_v27 = vld [vmem:[%s3988_s11] sm:$0x1]  ;;  %s3522_s11 = smov [#allocation11]  }
 0x96c   :  { %v2654_v44 = vpack.c.bf16 %v1958_v41, %v1959_v42  ;;  %v2665_v47 = vpack.c.bf16 %v1930_v38, %v1931_v43  ;;  %v1928_v53 = vsel %vm1353_vm15, %v1926_v5, %v1927_v35  ;;  %v1929_v54 = vsel %vm1353_vm15, %v1925_v33, %v1926_v5 }
 0x96d   :  { %3103 = vmatprep.mubr.msk.bf16.mxu1 %vm3715_vm8, %v2651_v40  ;;  %v2668_v55 = vpack.c.bf16 %v1928_v53, %v1929_v54 }
 0x96e   :  { %3104 = vmatmul.mubr.msk.bf16.vlgmr.msra.gmra.mrb[12].mxu1 %vm3734_vm10, %v2654_v44 }
 0x96f   :  { %3108 = vmatpush3.bf16.msra.mxu1 %v3344_v61  ;;  %3123 = vmatprep.mubr.msk.bf16.mxu1 %vm3865_vm1, %v2665_v47  ;;  %v3355_v61 = vld [vmem:[#allocation10 + $0x98] sm:$0xff]  }
 0x970   :  { %3109 = vmatprep.subr.bf16.mxu1 %v3345_v45 }
 0x973   :  { %3110 = vmatpush3.bf16.msra.mxu1 %v3345_v45 }
 0x974   :  { %3111 = vmatprep.subr.bf16.mxu1 %v3346_v48 }
 0x977   :  { %3112 = vmatpush3.bf16.msra.mxu1 %v3346_v48 }
 0x978   :  { %3113 = vmatprep.subr.bf16.mxu1 %v3347_v49 }
 0x97b   :  { %3114 = vmatpush3.bf16.msra.mxu1 %v3347_v49 }
 0x97c   :  { %3115 = vmatprep.subr.bf16.mxu1 %v3348_v50 }
 0x97f   :  { %3116 = vmatpush3.bf16.msra.mxu1 %v3348_v50 }
 0x980   :  { %3117 = vmatprep.subr.bf16.mxu1 %v3349_v31 }
 0x983   :  { %3118 = vmatpush3.bf16.msra.mxu1 %v3349_v31 }
 0x984   :  { %3119 = vmatprep.subr.bf16.mxu1 %v3350_v51 }
 0x987   :  { %3120 = vmatpush3.bf16.msra.mxu1 %v3350_v51 }
 0x988   :  { %3121 = vmatprep.subr.bf16.mxu1 %v3351_v46 }
 0x98b   :  { %3122 = vmatpush3.bf16.msra.mxu1 %v3351_v46 }
 0x98c   :  { %3127 = vmatprep.subr.bf16.mxu1 %v3352_v52 }
 0x98e   :  { %3124 = vmatmul.mubr.msk.bf16.vlgmr.msra.gmra.mrb[12].mxu1 %vm3881_vm4, %v2668_v55 }
 0x98f   :  { %3128 = vmatpush3.bf16.msra.mxu1 %v3352_v52  ;;  %3143 = vmatprep.mubr.bf16.mxu1 %v2179_v57 }
 0x990   :  { %3129 = vmatprep.subr.bf16.mxu1 %v3353_v56 }
 0x993   :  { %3130 = vmatpush3.bf16.msra.mxu1 %v3353_v56 }
 0x994   :  { %3131 = vmatprep.subr.bf16.mxu1 %v3354_v58 }
 0x997   :  { %3132 = vmatpush3.bf16.msra.mxu1 %v3354_v58 }
 0x998   :  { %3133 = vmatprep.subr.bf16.mxu1 %v3355_v61 }
 0x99b   :  { %3134 = vmatpush3.bf16.msra.mxu1 %v3355_v61 }
 0x99c   :  { %3135 = vmatprep.subr.bf16.mxu1 %v3356_v62 }
 0x99f   :  { %3136 = vmatpush3.bf16.msra.mxu1 %v3356_v62 }
 0x9a0   :  { %3137 = vmatprep.subr.bf16.mxu1 %v3357_v3 }
 0x9a3   :  { %3138 = vmatpush3.bf16.msra.mxu1 %v3357_v3 }
 0x9a4   :  { %3139 = vmatprep.subr.bf16.mxu1 %v3358_v63 }
 0x9a7   :  { %3140 = vmatpush3.bf16.msra.mxu1 %v3358_v63 }
 0x9a8   :  { %3141 = vmatprep.subr.bf16.mxu1 %v3359_v20 }
 0x9ab   :  { %3142 = vmatpush3.bf16.msra.mxu1 %v3359_v20 }
 0x9ae   :  { %3144 = vmatmul.mubr.bf16.vlgmr.msra.gmra.mrb[12].mxu1 %v2180_v39 }
 0xa81   :  { %v3145_v0 = vpop.f32.mrb[12].mxu1 }
 0xa82   :  { %v2280_v1 = vpop.f32.mrb[13].mxu1 }
 0xa83   :  { %v3146_v2 = vpop.f32.mrb[14].mxu1 }
 0xa84   :  { %v3209_v7 = vpack.c.bf16 %v3146_v2, %v3145_v0  ;;  %v2283_v8 = vpop.f32.mrb[15].mxu1 }
 0xa85   :  { %v3206_v9 = vpack.c.bf16 %v2283_v8, %v2280_v1 }
 0xa87   :  { %3207 = vmatpush3.bf16.msra.mxu0 %v3206_v9 }
 0xa88   :  { %3208 = vmatprep.subr.bf16.mxu0 %v3518_v59 }
 0xa8b   :  { %3210 = vmatpush3.bf16.msra.mxu0 %v3209_v7 }
 0xa8c   :  { %3211 = vmatprep.subr.bf16.mxu0 %v3518_v59 }
 0xa8e   :  { %3156 = vmatmul.mubr.msk.f32.vlgmr.msra.gmra.mrb[12].mxu0 %vm574_vm12, %v3521_v4 }
 0xa8f   :  { %3166 = vmatprep.mubr.msk.f32.mxu0 %vm3519_vm11, %v3520_v60 }
 0xb61   :  { %v2367_v10 = vpop.f32.mrb[12].mxu0 }
 0xb62   :  { %v2371_v11 = vmul.f32 0.03125, %v2367_v10  ;;  %v3157_v13 = vpop.f32.mrb[13].mxu0 }
 0xb64   :  { %v2375_v14 = vrot.slane %v2371_v11, %v3762_v6 }
 0xb66   :  { %v2376_v12 = vsub.f32 %v2280_v1, %v2375_v14  ;;  %v2377_v15 = vsub.f32 %v2283_v8, %v2375_v14  ;;  %v2378_v16 = vsub.f32 %v3145_v0, %v2375_v14  ;;  %v2379_v18 = vsub.f32 %v3146_v2, %v2375_v14 }
 0xb68   :  { %v2380_v19 = vmul.f32 %v2376_v12, %v2376_v12  ;;  %v2381_v21 = vmul.f32 %v2377_v15, %v2377_v15  ;;  %v2382_v24 = vmul.f32 %v2378_v16, %v2378_v16  ;;  %v2383_v22 = vmul.f32 %v2379_v18, %v2379_v18 }
 0xb6a   :  { %v3212_v23 = vpack.c.bf16 %v2381_v21, %v2380_v19  ;;  %v3215_v17 = vpack.c.bf16 %v2383_v22, %v2382_v24 }
 0xb6c   :  { %3213 = vmatpush3.bf16.msra.mxu0 %v3212_v23 }
 0xb6d   :  { %3214 = vmatprep.subr.bf16.mxu0 %v3518_v59  ;;  %v2680_v59 = vld [vmem:[%s3989_s12] ss:$0 sm:$0xff]  ;;  %s2511_s12 = sshll.u32 %s3522_s11, 4  ;;  %s2512_s12 = int_to_ptr.vmem [resolvable:$true] %s2511_s12 }
 0xb6e   :  { %s3478_s14 = scalar_lea.vmem %s2512_s12, 512  ;;  %p3483_p13 = scmp.lt.s32.totalorder %s2512_s12, %s2512_s12 }
 0xb6f   :  { %p3479_p12 = scmp.ne.s32.totalorder %s2512_s12, %s3478_s14  ;;  %p3484_p0 = scmp.lt.s32.totalorder %s3478_s14, %s3478_s14 }
 0xb70   :  { %3216 = vmatpush3.bf16.msra.mxu0 %v3215_v17 }
 0xb71   :  { %p3485_p1 = por %p3484_p0, %p3483_p13 }
 0xb73   :  { %3167 = vmatmul.mubr.msk.f32.vlgmr.msra.gmra.mrb[14].mxu0 %vm574_vm12, %v3521_v4  ;;  %p3486_p2 = pnand %p3485_p1, %p3479_p12 }
 0xc46   :  { %v2450_v60 = vpop.f32.mrb[14].mxu0 }
 0xc47   :  { %v2454_v25 = vmul.f32 0.03125, %v2450_v60  ;;  %v3168_v29 = vpop.f32.mrb[15].mxu0 }
 0xc49   :  { %v2455_v26 = vadd.f32 1e-05, %v2454_v25 }
 0xc4b   :  { %3366 = vrsqrt.f32 %v2455_v26 }
 0xc55   :  { %v3367_v28 = vpop.eup %3366 }
 0xc56   :  { %v2457_v30 = vmul.f32 %v3367_v28, %v2299_v27 }
 0xc58   :  { %v2462_v32 = vrot.slane %v2457_v30, %v3762_v6 }
 0xc5a   :  { %v2464_v33 = vmul.f32 %v2462_v32, %v2376_v12  ;;  %v2465_v34 = vmul.f32 %v2462_v32, %v2377_v15  ;;  %v2466_v4 = vmul.f32 %v2462_v32, %v2378_v16  ;;  %v2467_v35 = vmul.f32 %v2462_v32, %v2379_v18 }
 0xc5c   :  { %v2474_v36 = vadd.f32 %v2680_v59, %v2464_v33  ;;  %v2475_v37 = vadd.f32 %v2680_v59, %v2465_v34  ;;  %v2476_v38 = vadd.f32 %v2680_v59, %v2466_v4  ;;  %v2477_v39 = vadd.f32 %v2680_v59, %v2467_v35 }
 0xc5e   :  { %vm2478_vm6 = vcmp.ge.f32.partialorder %v2474_v36, 0.0  ;;  %vm2479_vm8 = vcmp.ge.f32.partialorder %v2475_v37, 0.0  ;;  %vm2480_vm10 = vcmp.ge.f32.partialorder %v2476_v38, 0.0  ;;  %vm2481_vm11 = vcmp.ge.f32.partialorder %v2477_v39, 0.0 }
 0xc5f   :  { %v2482_v40 = vmul.f32 0.01, %v2474_v36  ;;  %v2483_v41 = vmul.f32 0.01, %v2475_v37  ;;  %v2484_v42 = vmul.f32 0.01, %v2476_v38 }
 0xc60   :  { %v2485_v6 = vmul.f32 0.01, %v2477_v39 }
 0xc61   :  { %v2486_v43 = vsel %vm2478_vm6, %v2474_v36, %v2482_v40  ;;  %v2487_v44 = vsel %vm2479_vm8, %v2475_v37, %v2483_v41  ;;  %v2488_v45 = vsel %vm2480_vm10, %v2476_v38, %v2484_v42 }
 0xc62   :  { %v2489_v47 = vsel %vm2481_vm11, %v2477_v39, %v2485_v6  ;;  %vm2490_vm12 = vcmp.ge.f32.partialorder %v2486_v43, 0.0  ;;  %vm2491_vm13 = vcmp.ge.f32.partialorder %v2487_v44, 0.0  ;;  %vm2492_vm14 = vcmp.ge.f32.partialorder %v2488_v45, 0.0 }
 0xc63   :  { %vm2493_vm15 = vcmp.ge.f32.partialorder %v2489_v47, 0.0  ;;  %v2494_v48 = vmul.f32 0.01, %v2486_v43  ;;  %v2495_v49 = vmul.f32 0.01, %v2487_v44 }
 0xc64   :  { %v2496_v50 = vmul.f32 0.01, %v2488_v45  ;;  %v2497_v31 = vmul.f32 0.01, %v2489_v47 }
 0xc65   :  { %v2498_v51 = vsel %vm2490_vm12, %v2486_v43, %v2494_v48  ;;  %v2499_v46 = vsel %vm2491_vm13, %v2487_v44, %v2495_v49 }
 0xc66   :  { %v2500_v5 = vsel %vm2492_vm14, %v2488_v45, %v2496_v50  ;;  %v2501_v52 = vsel %vm2493_vm15, %v2489_v47, %v2497_v31  ;;  %2502 = vst [vmem:[#allocation11] sm:$0xff] %v2498_v51  ;;  %2503 = vst [vmem:[#allocation11 + $0x8] sm:$0xff] %v2499_v46 }
 0xc67   :  { %2504 = vst [vmem:[#allocation11 + $0x10] sm:$0xff] %v2500_v5  ;;  %2505 = vst [vmem:[#allocation11 + $0x18] sm:$0xff] %v2501_v52 }
 0xc68   :  { %3489 = shalt.err (!%p3486_p2)
}
 0xc69   :  { %s3490_s26 = scalar_lea.hbm %s3990_s13, 512 }
 0xc6a   :  { %p3491_p3 = scmp.ne.s32.totalorder %s3990_s13, %s3490_s26  ;;  %p3494_p4 = scmp.lt.u32.totalorder %s3490_s26, %s3990_s13 }
 0xc6c   :  { %p3496_p5 = pnand %p3494_p4, %p3491_p3 }
 0xc6e   :  { %3499 = shalt.err (!%p3496_p5)
}
 0xc6f   :  { %2517 = dma.vmem_to_hbm [thread:$0]  %s2512_s12, 512, %s3990_s13, [#allocation4], %s3513_s7, %s3513_s7, %s3514_s23  }
 0xc70   :  { %3506 = dma.done.wait [#allocation4], 512  }
 0xc71   :  { %3507 = vsyncadd [#allocation4], 4294966784 }
 0xc72   :  { %2521 = vsyncpa [#allocation3], 1 }
 0xc73   :  { %2522 = vsyncpa [#allocation6], 1 }
 0xc74   :  { %2523 = vsyncpa [#allocation9], 1 }
 0xc75   :  { %2524 = vsyncpa [#allocation4], 1 }

</bundles_post_ra>
